<compile_context>
chip_gen: v7x
topology: tpu7x:2x2x1
jax: 0.10.0
libtpu: 0.0.40
codegen_flags: <defaults>
</compile_context>

<pallas_src>
import math

import jax
import jax.numpy as jnp
from jax import lax
from jax.experimental import pallas as pl
from jax.experimental.pallas import tpu as pltpu

# ----------------------- small-BERT config -----------------------
HIDDEN = 128
N_HEADS = 2
HEAD_DIM = HIDDEN // N_HEADS
INTERMEDIATE = 256
N_LAYERS = 2
VOCAB = 128
MAX_POS = 32
N_CLASS = 4
CLS_PAD = 128          # classifier output padded to a lane-dense width
LN_EPS = 1e-12
ATTN_SCALE = 1.0 / math.sqrt(HEAD_DIM)


# ----------------------- in-kernel helpers -----------------------
def _layernorm_f32(x, g, b):
    mean = jnp.mean(x, axis=-1, keepdims=True)
    var = jnp.mean((x - mean) ** 2, axis=-1, keepdims=True)
    return (x - mean) * lax.rsqrt(var + LN_EPS) * g + b


# ----------------------- the single fused kernel -----------------------
def _make_fused_kernel(B, S):
    """Fused: emb-LN (layer 0) -> N_LAYERS encoder layers -> pooler+classifier (layer L-1)."""

    def kernel(emb_ref, mask_ref, eg_ref, eb_ref,
               wqkv_ref, bqkv_ref, wo_ref, bo_ref,
               ln1g_ref, ln1b_ref,
               wi_ref, bi_ref, wf_ref, bf_ref,
               ln2g_ref, ln2b_ref,
               pw_ref, pb_ref, cw_ref, cb_ref,
               logits_ref, h_scratch):
        layer = pl.program_id(0)

        # ---- layer-0 prologue: embedding LayerNorm into the resident h scratch ----
        @pl.when(layer == 0)
        def _():
            x = emb_ref[...].astype(jnp.float32)
            h_scratch[...] = _layernorm_f32(x, eg_ref[...], eb_ref[...])

        h = h_scratch[...]                                      # [B*S, H] f32

        # ---- fused Q|K|V projection: one [B*S,H] x [H,3H] matmul (bf16 in, f32 acc) ----
        qkv = jnp.dot(h.astype(jnp.bfloat16), wqkv_ref[0],
                      preferred_element_type=jnp.float32) + bqkv_ref[0]     # [B*S, 3H]

        wo = wo_ref[0]                                          # [H, H] bf16
        mask = mask_ref[...].astype(jnp.float32)                # [B, S] additive (-1e9 pad)

        # ---- per-(batch, head) attention + per-head output-projection-and-sum ----
        attn_rows = []
        for b in range(B):
            qkv_b = qkv[b * S:(b + 1) * S, :]                               # [S, 3H]
            mask_b = jnp.broadcast_to(mask[b:b + 1, :], (S, S))             # hoisted
            attn_b = None
            for hd in range(N_HEADS):
                q = qkv_b[:, hd * HEAD_DIM:(hd + 1) * HEAD_DIM]
                k = qkv_b[:, HIDDEN + hd * HEAD_DIM: HIDDEN + (hd + 1) * HEAD_DIM]
                v = qkv_b[:, 2 * HIDDEN + hd * HEAD_DIM: 2 * HIDDEN + (hd + 1) * HEAD_DIM]
                s = lax.dot_general(q.astype(jnp.bfloat16), k.astype(jnp.bfloat16),
                                    dimension_numbers=(((1,), (1,)), ((), ())),
                                    preferred_element_type=jnp.float32) * ATTN_SCALE
                s = s + mask_b
                s = s - jnp.max(s, axis=-1, keepdims=True)
                p = jnp.exp(s)
                p = p * pl.reciprocal(jnp.sum(p, axis=-1, keepdims=True), approx=True)
                ctx = jnp.dot(p.astype(jnp.bfloat16), v.astype(jnp.bfloat16),
                              preferred_element_type=jnp.float32)           # [S, Dh]
                # per-head output projection and accumulate (no lane-axis concat of heads)
                contrib = jnp.dot(ctx.astype(jnp.bfloat16),
                                  wo[hd * HEAD_DIM:(hd + 1) * HEAD_DIM, :],
                                  preferred_element_type=jnp.float32)       # [S, H]
                attn_b = contrib if attn_b is None else attn_b + contrib
            attn_rows.append(attn_b)
        attn_out = jnp.concatenate(attn_rows, axis=0) + bo_ref[0]           # [B*S, H]

        # ---- residual + LN1, FFN (tanh-GELU on EUP), residual + LN2 ----
        h1 = _layernorm_f32(attn_out + h, ln1g_ref[0], ln1b_ref[0])
        inter = jnp.dot(h1.astype(jnp.bfloat16), wi_ref[0],
                        preferred_element_type=jnp.float32) + bi_ref[0]
        inter = jax.nn.gelu(inter, approximate=True)
        ffn = jnp.dot(inter.astype(jnp.bfloat16), wf_ref[0],
                      preferred_element_type=jnp.float32) + bf_ref[0]
        h2 = _layernorm_f32(ffn + h1, ln2g_ref[0], ln2b_ref[0])
        h_scratch[...] = h2

        # ---- last-layer epilogue: pooler(tanh) + classifier, lane-dense logits ----
        @pl.when(layer == pl.num_programs(0) - 1)
        def _():
            # CLS token of each batch element = row b*S of the flattened activations.
            cls = jnp.concatenate([h2[b * S:b * S + 1, :] for b in range(B)], axis=0)
            pooled = jnp.tanh(jnp.dot(cls.astype(jnp.bfloat16), pw_ref[...],
                                      preferred_element_type=jnp.float32) + pb_ref[...])
            logits = jnp.dot(pooled.astype(jnp.bfloat16), cw_ref[...],
                             preferred_element_type=jnp.float32) + cb_ref[...]  # [B, 128]
            logits_ref[...] = logits.astype(logits_ref.dtype)

    return kernel


def _cost_estimate(B, S):
    BS = B * S
    flops_layer = (2 * BS * HIDDEN * 3 * HIDDEN                                 # qkv
                   + B * N_HEADS * (4 * S * S * HEAD_DIM                        # scores+ctx
                                    + 2 * S * HEAD_DIM * HIDDEN)                # out proj
                   + 4 * BS * HIDDEN * INTERMEDIATE)                            # ffn
    flops = N_LAYERS * flops_layer + 2 * B * HIDDEN * HIDDEN + 2 * B * HIDDEN * CLS_PAD
    trans = N_LAYERS * (B * N_HEADS * S * S + BS * INTERMEDIATE) + B * HIDDEN
    wbytes_layer = (2 * (HIDDEN * 3 * HIDDEN + HIDDEN * HIDDEN
                         + 2 * HIDDEN * INTERMEDIATE)                           # bf16 weights
                    + 4 * (3 * HIDDEN + 6 * HIDDEN + INTERMEDIATE))             # f32 bias/LN
    bytes_accessed = (N_LAYERS * wbytes_layer
                      + BS * HIDDEN * 4 + B * S * 4                             # emb + mask
                      + 2 * (HIDDEN * HIDDEN + HIDDEN * CLS_PAD)                # head weights
                      + 4 * (HIDDEN + CLS_PAD)                                  # head biases
                      + B * CLS_PAD * 4)                                        # logits
    return pl.CostEstimate(flops=flops, transcendentals=trans,
                           bytes_accessed=bytes_accessed)


def bert_fused(emb_flat, add_mask, p, B, S):
    """emb_flat: [B*S, H] f32 (pre-LN embeddings); add_mask: [B, S] f32 additive mask."""
    H, I = HIDDEN, INTERMEDIATE
    BS = B * S

    def const2(shape):
        return pl.BlockSpec(shape, lambda l: (0, 0))        # resident across all layers

    def layer3(shape):
        return pl.BlockSpec(shape, lambda l: (l, 0, 0))     # selected by layer grid index

    logits_pad = pl.pallas_call(
        _make_fused_kernel(B, S),
        out_shape=jax.ShapeDtypeStruct((B, CLS_PAD), jnp.float32),
        grid=(N_LAYERS,),
        in_specs=[
            const2((BS, H)),                  # embeddings (pre-LN)
            const2((B, S)),                   # additive attention mask
            const2((1, H)), const2((1, H)),   # embedding LN gamma / beta
            layer3((1, H, 3 * H)),            # wqkv (bf16), stacked over layers
            layer3((1, 1, 3 * H)),            # bqkv
            layer3((1, H, H)),                # wo (bf16)
            layer3((1, 1, H)),                # bo
            layer3((1, 1, H)), layer3((1, 1, H)),   # ln1 gamma / beta
            layer3((1, H, I)),                # wi (bf16)
            layer3((1, 1, I)),                # bi
            layer3((1, I, H)),                # wf (bf16)
            layer3((1, 1, H)),                # bf
            layer3((1, 1, H)), layer3((1, 1, H)),   # ln2 gamma / beta
            const2((H, H)),                   # pooler weight (bf16)
            const2((1, H)),                   # pooler bias
            const2((H, CLS_PAD)),             # classifier weight (bf16, lane padded)
            const2((1, CLS_PAD)),             # classifier bias
        ],
        out_specs=pl.BlockSpec((B, CLS_PAD), lambda l: (0, 0)),   # written at last step only
        scratch_shapes=[pltpu.VMEM((BS, H), jnp.float32)],        # resident hidden states
        compiler_params=pltpu.CompilerParams(
            dimension_semantics=("arbitrary",)),   # layer axis is sequential (h carry)
        cost_estimate=_cost_estimate(B, S),
    )(emb_flat, add_mask,
      p["emb_ln_g"], p["emb_ln_b"],
      p["wqkv"], p["bqkv"], p["wo"], p["bo"],
      p["ln1_g"], p["ln1_b"],
      p["wi"], p["bi"], p["wf"], p["bf"],
      p["ln2_g"], p["ln2_b"],
      p["pool_w"], p["pool_b"], p["cls_w"], p["cls_b"])
    return logits_pad[:, :N_CLASS]     # drop lane padding


# ----------------------- parameter init -----------------------
def init_params(key):
    def norm(k, shape, dtype=jnp.float32):
        return (0.02 * jax.random.normal(k, shape, dtype=jnp.float32)).astype(dtype)

    keys = iter(jax.random.split(key, 8 + 8 * N_LAYERS))
    params = {
        "word_emb": norm(next(keys), (VOCAB, HIDDEN)),
        "pos_emb": norm(next(keys), (MAX_POS, HIDDEN)),
        "type_emb": norm(next(keys), (2, HIDDEN)),
        "emb_ln_g": jnp.ones((1, HIDDEN), jnp.float32),
        "emb_ln_b": jnp.zeros((1, HIDDEN), jnp.float32),
        # MXU weights stored in bf16 (halves weight DMA bytes; f32 accumulate in-kernel)
        "pool_w": norm(next(keys), (HIDDEN, HIDDEN), jnp.bfloat16),
        "pool_b": jnp.zeros((1, HIDDEN), jnp.float32),
        # classifier weight padded on lanes to CLS_PAD (extra columns are zero)
        "cls_w": jnp.zeros((HIDDEN, CLS_PAD), jnp.bfloat16).at[:, :N_CLASS].set(
            norm(next(keys), (HIDDEN, N_CLASS), jnp.bfloat16)),
        "cls_b": jnp.zeros((1, CLS_PAD), jnp.float32),
    }
    # Per-layer weights stacked along a leading layer axis -> one pallas_call, layer grid.
    stacked = {k: [] for k in ["wqkv", "bqkv", "wo", "bo", "ln1_g", "ln1_b",
                               "wi", "bi", "wf", "bf", "ln2_g", "ln2_b"]}
    for _ in range(N_LAYERS):
        wq = norm(next(keys), (HIDDEN, HIDDEN))
        wk = norm(next(keys), (HIDDEN, HIDDEN))
        wv = norm(next(keys), (HIDDEN, HIDDEN))
        stacked["wqkv"].append(jnp.concatenate([wq, wk, wv], axis=1).astype(jnp.bfloat16))
        stacked["bqkv"].append(jnp.zeros((1, 3 * HIDDEN), jnp.float32))
        stacked["wo"].append(norm(next(keys), (HIDDEN, HIDDEN), jnp.bfloat16))
        stacked["bo"].append(jnp.zeros((1, HIDDEN), jnp.float32))
        stacked["ln1_g"].append(jnp.ones((1, HIDDEN), jnp.float32))
        stacked["ln1_b"].append(jnp.zeros((1, HIDDEN), jnp.float32))
        stacked["wi"].append(norm(next(keys), (HIDDEN, INTERMEDIATE), jnp.bfloat16))
        stacked["bi"].append(jnp.zeros((1, INTERMEDIATE), jnp.float32))
        stacked["wf"].append(norm(next(keys), (INTERMEDIATE, HIDDEN), jnp.bfloat16))
        stacked["bf"].append(jnp.zeros((1, HIDDEN), jnp.float32))
        stacked["ln2_g"].append(jnp.ones((1, HIDDEN), jnp.float32))
        stacked["ln2_b"].append(jnp.zeros((1, HIDDEN), jnp.float32))
    for k, v in stacked.items():
        params[k] = jnp.stack(v, axis=0)
    return params


# ----------------------- forward pass -----------------------
def bert_classifier_forward(params, input_ids, attention_mask):
    B, S = input_ids.shape

    # Embedding gather + adds are glue, left to XLA fusion; token_type_ids all zero.
    we = jnp.take(params["word_emb"], input_ids, axis=0)          # [B, S, H]
    pe = params["pos_emb"][:S][None, :, :]                        # [1, S, H]
    te = params["type_emb"][0][None, None, :]                     # [1, 1, H]
    emb = (we + pe + te).reshape(B * S, HIDDEN)                   # pre-LN embeddings

    # Additive attention mask: 0 for real tokens, -1e9 for padding.  [B, S]
    add_mask = (1.0 - attention_mask.astype(jnp.float32)) * -1e9

    # Single fused pallas_call: emb-LN + all encoder layers + pooler + classifier.
    return bert_fused(emb, add_mask, params, B, S)                # [B, n_class]


# ----------------------- demo -----------------------
if __name__ == "__main__":
    key = jax.random.PRNGKey(0)
    pkey, ikey = jax.random.split(key)

    params = init_params(pkey)

    B, S = 2, 16
    input_ids = jax.random.randint(ikey, (B, S), 0, VOCAB, dtype=jnp.int32)
    # Last 4 tokens of the second example are padding.
    attention_mask = jnp.ones((B, S), dtype=jnp.int32).at[1, -4:].set(0)

    logits = jax.jit(bert_classifier_forward)(params, input_ids, attention_mask)
    jax.block_until_ready(logits)
    assert logits.shape == (B, N_CLASS) and logits.dtype == jnp.float32
    assert bool(jnp.all(jnp.isfinite(logits)))
    print("KERNEL_OK")
</pallas_src>

<mosaic_0001>
module attributes {stable_mosaic.version = 11 : i64} {
  func.func @kernel(%arg0: i32, %arg1: memref<32x128xf32, #tpu.memory_space<vmem>>, %arg2: memref<2x16xf32, #tpu.memory_space<vmem>>, %arg3: memref<1x128xf32, #tpu.memory_space<vmem>>, %arg4: memref<1x128xf32, #tpu.memory_space<vmem>>, %arg5: memref<1x128x384xbf16, #tpu.memory_space<vmem>>, %arg6: memref<1x1x384xf32, #tpu.memory_space<vmem>>, %arg7: memref<1x128x128xbf16, #tpu.memory_space<vmem>>, %arg8: memref<1x1x128xf32, #tpu.memory_space<vmem>>, %arg9: memref<1x1x128xf32, #tpu.memory_space<vmem>>, %arg10: memref<1x1x128xf32, #tpu.memory_space<vmem>>, %arg11: memref<1x128x256xbf16, #tpu.memory_space<vmem>>, %arg12: memref<1x1x256xf32, #tpu.memory_space<vmem>>, %arg13: memref<1x256x128xbf16, #tpu.memory_space<vmem>>, %arg14: memref<1x1x128xf32, #tpu.memory_space<vmem>>, %arg15: memref<1x1x128xf32, #tpu.memory_space<vmem>>, %arg16: memref<1x1x128xf32, #tpu.memory_space<vmem>>, %arg17: memref<128x128xbf16, #tpu.memory_space<vmem>>, %arg18: memref<1x128xf32, #tpu.memory_space<vmem>>, %arg19: memref<128x128xbf16, #tpu.memory_space<vmem>>, %arg20: memref<1x128xf32, #tpu.memory_space<vmem>>, %arg21: memref<2x128xf32, #tpu.memory_space<vmem>>, %arg22: memref<32x128xf32, #tpu.memory_space<vmem>>) attributes {dimension_semantics = [#tpu.dimension_semantics<arbitrary>], iteration_bounds = array<i64: 2>, scalar_prefetch = 0 : i64, scratch_operands = 1 : i64, tpu.core_type = #tpu.core_type<tc>, window_params = [{pipeline_mode = #tpu.pipeline_mode<synchronous>, transform_indices = @transform_0, window_bounds = array<i64: 32, 128>}, {pipeline_mode = #tpu.pipeline_mode<synchronous>, transform_indices = @transform_1, window_bounds = array<i64: 2, 16>}, {pipeline_mode = #tpu.pipeline_mode<synchronous>, transform_indices = @transform_2, window_bounds = array<i64: 1, 128>}, {pipeline_mode = #tpu.pipeline_mode<synchronous>, transform_indices = @transform_3, window_bounds = array<i64: 1, 128>}, {transform_indices = @transform_4, window_bounds = array<i64: 1, 128, 384>}, {transform_indices = @transform_5, window_bounds = array<i64: 1, 1, 384>}, {transform_indices = @transform_6, window_bounds = array<i64: 1, 128, 128>}, {transform_indices = @transform_7, window_bounds = array<i64: 1, 1, 128>}, {transform_indices = @transform_8, window_bounds = array<i64: 1, 1, 128>}, {transform_indices = @transform_9, window_bounds = array<i64: 1, 1, 128>}, {transform_indices = @transform_10, window_bounds = array<i64: 1, 128, 256>}, {transform_indices = @transform_11, window_bounds = array<i64: 1, 1, 256>}, {transform_indices = @transform_12, window_bounds = array<i64: 1, 256, 128>}, {transform_indices = @transform_13, window_bounds = array<i64: 1, 1, 128>}, {transform_indices = @transform_14, window_bounds = array<i64: 1, 1, 128>}, {transform_indices = @transform_15, window_bounds = array<i64: 1, 1, 128>}, {pipeline_mode = #tpu.pipeline_mode<synchronous>, transform_indices = @transform_16, window_bounds = array<i64: 128, 128>}, {pipeline_mode = #tpu.pipeline_mode<synchronous>, transform_indices = @transform_17, window_bounds = array<i64: 1, 128>}, {pipeline_mode = #tpu.pipeline_mode<synchronous>, transform_indices = @transform_18, window_bounds = array<i64: 128, 128>}, {pipeline_mode = #tpu.pipeline_mode<synchronous>, transform_indices = @transform_19, window_bounds = array<i64: 1, 128>}, {pipeline_mode = #tpu.pipeline_mode<synchronous>, transform_indices = @transform_20, window_bounds = array<i64: 2, 128>}]} {
    %c0_i32 = arith.constant 0 : i32
    %0 = arith.cmpi eq, %arg0, %c0_i32 : i32
    %1 = arith.extui %0 : i1 to i32
    %c0_i32_0 = arith.constant 0 : i32
    %2 = arith.cmpi ne, %1, %c0_i32_0 : i32
    scf.if %2 {
      %c0_83 = arith.constant 0 : index
      %c0_84 = arith.constant 0 : index
      %217 = vector.load %arg1[%c0_83, %c0_84] : memref<32x128xf32, #tpu.memory_space<vmem>>, vector<32x128xf32>
      %c0_85 = arith.constant 0 : index
      %c0_86 = arith.constant 0 : index
      %218 = vector.load %arg3[%c0_85, %c0_86] : memref<1x128xf32, #tpu.memory_space<vmem>>, vector<1x128xf32>
      %c0_87 = arith.constant 0 : index
      %c0_88 = arith.constant 0 : index
      %219 = vector.load %arg4[%c0_87, %c0_88] : memref<1x128xf32, #tpu.memory_space<vmem>>, vector<1x128xf32>
      %cst_89 = arith.constant dense<0.000000e+00> : vector<32xf32>
      %220 = vector.multi_reduction <add>, %217, %cst_89 [1] : vector<32x128xf32> to vector<32xf32>
      %221 = vector.shape_cast %220 : vector<32xf32> to vector<32x1xf32>
      %cst_90 = arith.constant 1.280000e+02 : f32
      %222 = vector.broadcast %cst_90 : f32 to vector<32x1xf32>
      %223 = arith.divf %221, %222 : vector<32x1xf32>
      %224 = vector.broadcast %223 : vector<32x1xf32> to vector<32x128xf32>
      %225 = arith.subf %217, %224 : vector<32x128xf32>
      %226 = arith.mulf %225, %225 : vector<32x128xf32>
      %cst_91 = arith.constant dense<0.000000e+00> : vector<32xf32>
      %227 = vector.multi_reduction <add>, %226, %cst_91 [1] : vector<32x128xf32> to vector<32xf32>
      %228 = vector.shape_cast %227 : vector<32xf32> to vector<32x1xf32>
      %cst_92 = arith.constant 1.280000e+02 : f32
      %229 = vector.broadcast %cst_92 : f32 to vector<32x1xf32>
      %230 = arith.divf %228, %229 : vector<32x1xf32>
      %231 = vector.broadcast %223 : vector<32x1xf32> to vector<32x128xf32>
      %232 = arith.subf %217, %231 : vector<32x128xf32>
      %cst_93 = arith.constant 9.99999996E-13 : f32
      %233 = vector.broadcast %cst_93 : f32 to vector<32x1xf32>
      %234 = arith.addf %230, %233 : vector<32x1xf32>
      %235 = math.rsqrt %234 : vector<32x1xf32>
      %236 = vector.broadcast %235 : vector<32x1xf32> to vector<32x128xf32>
      %237 = arith.mulf %232, %236 : vector<32x128xf32>
      %238 = vector.broadcast %218 : vector<1x128xf32> to vector<32x128xf32>
      %239 = arith.mulf %237, %238 : vector<32x128xf32>
      %240 = vector.broadcast %219 : vector<1x128xf32> to vector<32x128xf32>
      %241 = arith.addf %239, %240 : vector<32x128xf32>
      %c0_94 = arith.constant 0 : index
      %c0_95 = arith.constant 0 : index
      %242 = vector.load %arg22[%c0_94, %c0_95] : memref<32x128xf32, #tpu.memory_space<vmem>>, vector<32x128xf32>
      tpu.vector_store %arg22[%c0_94, %c0_95], %241 {strides = array<i32>} : memref<32x128xf32, #tpu.memory_space<vmem>>, vector<32x128xf32>,
    } else {
    }
    %c0 = arith.constant 0 : index
    %c0_1 = arith.constant 0 : index
    %3 = vector.load %arg22[%c0, %c0_1] : memref<32x128xf32, #tpu.memory_space<vmem>>, vector<32x128xf32>
    %4 = arith.truncf %3 : vector<32x128xf32> to vector<32x128xbf16>
    %c0_2 = arith.constant 0 : index
    %c0_3 = arith.constant 0 : index
    %c0_4 = arith.constant 0 : index
    %5 = vector.load %arg5[%c0_2, %c0_3, %c0_4] : memref<1x128x384xbf16, #tpu.memory_space<vmem>>, vector<1x128x384xbf16>
    %6 = vector.shape_cast %5 : vector<1x128x384xbf16> to vector<128x384xbf16>
    %cst = arith.constant dense<0.000000e+00> : vector<32x384xf32>
    %7 = tpu.matmul %4, %6, %cst {dimension_numbers = #tpu.dot_dimension_numbers<[1], [0], [0], [1], [0, 0, 1, 1], [], []>} : vector<32x128xbf16>, vector<128x384xbf16>, vector<32x384xf32> -> vector<32x384xf32>
    %c0_5 = arith.constant 0 : index
    %c0_6 = arith.constant 0 : index
    %c0_7 = arith.constant 0 : index
    %8 = vector.load %arg6[%c0_5, %c0_6, %c0_7] : memref<1x1x384xf32, #tpu.memory_space<vmem>>, vector<1x1x384xf32>
    %9 = vector.shape_cast %8 : vector<1x1x384xf32> to vector<1x384xf32>
    %10 = vector.broadcast %9 : vector<1x384xf32> to vector<32x384xf32>
    %11 = arith.addf %7, %10 : vector<32x384xf32>
    %c0_8 = arith.constant 0 : index
    %c0_9 = arith.constant 0 : index
    %c0_10 = arith.constant 0 : index
    %12 = vector.load %arg7[%c0_8, %c0_9, %c0_10] : memref<1x128x128xbf16, #tpu.memory_space<vmem>>, vector<1x128x128xbf16>
    %13 = vector.shape_cast %12 : vector<1x128x128xbf16> to vector<128x128xbf16>
    %c0_11 = arith.constant 0 : index
    %c0_12 = arith.constant 0 : index
    %14 = vector.load %arg2[%c0_11, %c0_12] : memref<2x16xf32, #tpu.memory_space<vmem>>, vector<2x16xf32>
    %15 = vector.extract_strided_slice %11 {offsets = [0, 0], sizes = [16, 384], strides = [1, 1]} : vector<32x384xf32> to vector<16x384xf32>
    %16 = vector.extract_strided_slice %14 {offsets = [0, 0], sizes = [1, 16], strides = [1, 1]} : vector<2x16xf32> to vector<1x16xf32>
    %17 = vector.shape_cast %16 : vector<1x16xf32> to vector<1x16xf32>
    %18 = vector.broadcast %17 : vector<1x16xf32> to vector<16x16xf32>
    %19 = vector.extract_strided_slice %15 {offsets = [0, 0], sizes = [16, 64], strides = [1, 1]} : vector<16x384xf32> to vector<16x64xf32>
    %20 = vector.extract_strided_slice %15 {offsets = [0, 128], sizes = [16, 64], strides = [1, 1]} : vector<16x384xf32> to vector<16x64xf32>
    %21 = vector.extract_strided_slice %15 {offsets = [0, 256], sizes = [16, 64], strides = [1, 1]} : vector<16x384xf32> to vector<16x64xf32>
    %22 = arith.truncf %19 : vector<16x64xf32> to vector<16x64xbf16>
    %23 = arith.truncf %20 : vector<16x64xf32> to vector<16x64xbf16>
    %cst_13 = arith.constant dense<0.000000e+00> : vector<16x16xf32>
    %24 = tpu.matmul %22, %23, %cst_13 {dimension_numbers = #tpu.dot_dimension_numbers<[1], [1], [0], [0], [0, 0, 1, 0], [], []>} : vector<16x64xbf16>, vector<16x64xbf16>, vector<16x16xf32> -> vector<16x16xf32>
    %cst_14 = arith.constant 1.250000e-01 : f32
    %25 = vector.broadcast %cst_14 : f32 to vector<16x16xf32>
    %26 = arith.mulf %24, %25 : vector<16x16xf32>
    %27 = arith.addf %26, %18 : vector<16x16xf32>
    %cst_15 = arith.constant dense<0xFF800000> : vector<16xf32>
    %28 = vector.multi_reduction <maximumf>, %27, %cst_15 [1] : vector<16x16xf32> to vector<16xf32>
    %29 = vector.shape_cast %28 : vector<16xf32> to vector<16x1xf32>
    %30 = vector.broadcast %29 : vector<16x1xf32> to vector<16x16xf32>
    %31 = arith.subf %27, %30 : vector<16x16xf32>
    %32 = math.exp %31 : vector<16x16xf32>
    %cst_16 = arith.constant dense<0.000000e+00> : vector<16xf32>
    %33 = vector.multi_reduction <add>, %32, %cst_16 [1] : vector<16x16xf32> to vector<16xf32>
    %34 = vector.shape_cast %33 : vector<16xf32> to vector<16x1xf32>
    %35 = tpu.reciprocal %34 {approx = true} : vector<16x1xf32> -> vector<16x1xf32>
    %36 = vector.broadcast %35 : vector<16x1xf32> to vector<16x16xf32>
    %37 = arith.mulf %32, %36 : vector<16x16xf32>
    %38 = arith.truncf %37 : vector<16x16xf32> to vector<16x16xbf16>
    %39 = arith.truncf %21 : vector<16x64xf32> to vector<16x64xbf16>
    %cst_17 = arith.constant dense<0.000000e+00> : vector<16x64xf32>
    %40 = tpu.matmul %38, %39, %cst_17 {dimension_numbers = #tpu.dot_dimension_numbers<[1], [0], [0], [1], [0, 0, 1, 1], [], []>} : vector<16x16xbf16>, vector<16x64xbf16>, vector<16x64xf32> -> vector<16x64xf32>
    %41 = arith.truncf %40 : vector<16x64xf32> to vector<16x64xbf16>
    %42 = vector.extract_strided_slice %13 {offsets = [0, 0], sizes = [64, 128], strides = [1, 1]} : vector<128x128xbf16> to vector<64x128xbf16>
    %cst_18 = arith.constant dense<0.000000e+00> : vector<16x128xf32>
    %43 = tpu.matmul %41, %42, %cst_18 {dimension_numbers = #tpu.dot_dimension_numbers<[1], [0], [0], [1], [0, 0, 1, 1], [], []>} : vector<16x64xbf16>, vector<64x128xbf16>, vector<16x128xf32> -> vector<16x128xf32>
    %44 = vector.extract_strided_slice %15 {offsets = [0, 64], sizes = [16, 64], strides = [1, 1]} : vector<16x384xf32> to vector<16x64xf32>
    %45 = vector.extract_strided_slice %15 {offsets = [0, 192], sizes = [16, 64], strides = [1, 1]} : vector<16x384xf32> to vector<16x64xf32>
    %46 = vector.extract_strided_slice %15 {offsets = [0, 320], sizes = [16, 64], strides = [1, 1]} : vector<16x384xf32> to vector<16x64xf32>
    %47 = arith.truncf %44 : vector<16x64xf32> to vector<16x64xbf16>
    %48 = arith.truncf %45 : vector<16x64xf32> to vector<16x64xbf16>
    %cst_19 = arith.constant dense<0.000000e+00> : vector<16x16xf32>
    %49 = tpu.matmul %47, %48, %cst_19 {dimension_numbers = #tpu.dot_dimension_numbers<[1], [1], [0], [0], [0, 0, 1, 0], [], []>} : vector<16x64xbf16>, vector<16x64xbf16>, vector<16x16xf32> -> vector<16x16xf32>
    %cst_20 = arith.constant 1.250000e-01 : f32
    %50 = vector.broadcast %cst_20 : f32 to vector<16x16xf32>
    %51 = arith.mulf %49, %50 : vector<16x16xf32>
    %52 = arith.addf %51, %18 : vector<16x16xf32>
    %cst_21 = arith.constant dense<0xFF800000> : vector<16xf32>
    %53 = vector.multi_reduction <maximumf>, %52, %cst_21 [1] : vector<16x16xf32> to vector<16xf32>
    %54 = vector.shape_cast %53 : vector<16xf32> to vector<16x1xf32>
    %55 = vector.broadcast %54 : vector<16x1xf32> to vector<16x16xf32>
    %56 = arith.subf %52, %55 : vector<16x16xf32>
    %57 = math.exp %56 : vector<16x16xf32>
    %cst_22 = arith.constant dense<0.000000e+00> : vector<16xf32>
    %58 = vector.multi_reduction <add>, %57, %cst_22 [1] : vector<16x16xf32> to vector<16xf32>
    %59 = vector.shape_cast %58 : vector<16xf32> to vector<16x1xf32>
    %60 = tpu.reciprocal %59 {approx = true} : vector<16x1xf32> -> vector<16x1xf32>
    %61 = vector.broadcast %60 : vector<16x1xf32> to vector<16x16xf32>
    %62 = arith.mulf %57, %61 : vector<16x16xf32>
    %63 = arith.truncf %62 : vector<16x16xf32> to vector<16x16xbf16>
    %64 = arith.truncf %46 : vector<16x64xf32> to vector<16x64xbf16>
    %cst_23 = arith.constant dense<0.000000e+00> : vector<16x64xf32>
    %65 = tpu.matmul %63, %64, %cst_23 {dimension_numbers = #tpu.dot_dimension_numbers<[1], [0], [0], [1], [0, 0, 1, 1], [], []>} : vector<16x16xbf16>, vector<16x64xbf16>, vector<16x64xf32> -> vector<16x64xf32>
    %66 = arith.truncf %65 : vector<16x64xf32> to vector<16x64xbf16>
    %67 = vector.extract_strided_slice %13 {offsets = [64, 0], sizes = [64, 128], strides = [1, 1]} : vector<128x128xbf16> to vector<64x128xbf16>
    %cst_24 = arith.constant dense<0.000000e+00> : vector<16x128xf32>
    %68 = tpu.matmul %66, %67, %cst_24 {dimension_numbers = #tpu.dot_dimension_numbers<[1], [0], [0], [1], [0, 0, 1, 1], [], []>} : vector<16x64xbf16>, vector<64x128xbf16>, vector<16x128xf32> -> vector<16x128xf32>
    %69 = arith.addf %43, %68 : vector<16x128xf32>
    %70 = vector.extract_strided_slice %11 {offsets = [16, 0], sizes = [16, 384], strides = [1, 1]} : vector<32x384xf32> to vector<16x384xf32>
    %71 = vector.extract_strided_slice %14 {offsets = [1, 0], sizes = [1, 16], strides = [1, 1]} : vector<2x16xf32> to vector<1x16xf32>
    %72 = vector.shape_cast %71 : vector<1x16xf32> to vector<1x16xf32>
    %73 = vector.broadcast %72 : vector<1x16xf32> to vector<16x16xf32>
    %74 = vector.extract_strided_slice %70 {offsets = [0, 0], sizes = [16, 64], strides = [1, 1]} : vector<16x384xf32> to vector<16x64xf32>
    %75 = vector.extract_strided_slice %70 {offsets = [0, 128], sizes = [16, 64], strides = [1, 1]} : vector<16x384xf32> to vector<16x64xf32>
    %76 = vector.extract_strided_slice %70 {offsets = [0, 256], sizes = [16, 64], strides = [1, 1]} : vector<16x384xf32> to vector<16x64xf32>
    %77 = arith.truncf %74 : vector<16x64xf32> to vector<16x64xbf16>
    %78 = arith.truncf %75 : vector<16x64xf32> to vector<16x64xbf16>
    %cst_25 = arith.constant dense<0.000000e+00> : vector<16x16xf32>
    %79 = tpu.matmul %77, %78, %cst_25 {dimension_numbers = #tpu.dot_dimension_numbers<[1], [1], [0], [0], [0, 0, 1, 0], [], []>} : vector<16x64xbf16>, vector<16x64xbf16>, vector<16x16xf32> -> vector<16x16xf32>
    %cst_26 = arith.constant 1.250000e-01 : f32
    %80 = vector.broadcast %cst_26 : f32 to vector<16x16xf32>
    %81 = arith.mulf %79, %80 : vector<16x16xf32>
    %82 = arith.addf %81, %73 : vector<16x16xf32>
    %cst_27 = arith.constant dense<0xFF800000> : vector<16xf32>
    %83 = vector.multi_reduction <maximumf>, %82, %cst_27 [1] : vector<16x16xf32> to vector<16xf32>
    %84 = vector.shape_cast %83 : vector<16xf32> to vector<16x1xf32>
    %85 = vector.broadcast %84 : vector<16x1xf32> to vector<16x16xf32>
    %86 = arith.subf %82, %85 : vector<16x16xf32>
    %87 = math.exp %86 : vector<16x16xf32>
    %cst_28 = arith.constant dense<0.000000e+00> : vector<16xf32>
    %88 = vector.multi_reduction <add>, %87, %cst_28 [1] : vector<16x16xf32> to vector<16xf32>
    %89 = vector.shape_cast %88 : vector<16xf32> to vector<16x1xf32>
    %90 = tpu.reciprocal %89 {approx = true} : vector<16x1xf32> -> vector<16x1xf32>
    %91 = vector.broadcast %90 : vector<16x1xf32> to vector<16x16xf32>
    %92 = arith.mulf %87, %91 : vector<16x16xf32>
    %93 = arith.truncf %92 : vector<16x16xf32> to vector<16x16xbf16>
    %94 = arith.truncf %76 : vector<16x64xf32> to vector<16x64xbf16>
    %cst_29 = arith.constant dense<0.000000e+00> : vector<16x64xf32>
    %95 = tpu.matmul %93, %94, %cst_29 {dimension_numbers = #tpu.dot_dimension_numbers<[1], [0], [0], [1], [0, 0, 1, 1], [], []>} : vector<16x16xbf16>, vector<16x64xbf16>, vector<16x64xf32> -> vector<16x64xf32>
    %96 = arith.truncf %95 : vector<16x64xf32> to vector<16x64xbf16>
    %97 = vector.extract_strided_slice %13 {offsets = [0, 0], sizes = [64, 128], strides = [1, 1]} : vector<128x128xbf16> to vector<64x128xbf16>
    %cst_30 = arith.constant dense<0.000000e+00> : vector<16x128xf32>
    %98 = tpu.matmul %96, %97, %cst_30 {dimension_numbers = #tpu.dot_dimension_numbers<[1], [0], [0], [1], [0, 0, 1, 1], [], []>} : vector<16x64xbf16>, vector<64x128xbf16>, vector<16x128xf32> -> vector<16x128xf32>
    %99 = vector.extract_strided_slice %70 {offsets = [0, 64], sizes = [16, 64], strides = [1, 1]} : vector<16x384xf32> to vector<16x64xf32>
    %100 = vector.extract_strided_slice %70 {offsets = [0, 192], sizes = [16, 64], strides = [1, 1]} : vector<16x384xf32> to vector<16x64xf32>
    %101 = vector.extract_strided_slice %70 {offsets = [0, 320], sizes = [16, 64], strides = [1, 1]} : vector<16x384xf32> to vector<16x64xf32>
    %102 = arith.truncf %99 : vector<16x64xf32> to vector<16x64xbf16>
    %103 = arith.truncf %100 : vector<16x64xf32> to vector<16x64xbf16>
    %cst_31 = arith.constant dense<0.000000e+00> : vector<16x16xf32>
    %104 = tpu.matmul %102, %103, %cst_31 {dimension_numbers = #tpu.dot_dimension_numbers<[1], [1], [0], [0], [0, 0, 1, 0], [], []>} : vector<16x64xbf16>, vector<16x64xbf16>, vector<16x16xf32> -> vector<16x16xf32>
    %cst_32 = arith.constant 1.250000e-01 : f32
    %105 = vector.broadcast %cst_32 : f32 to vector<16x16xf32>
    %106 = arith.mulf %104, %105 : vector<16x16xf32>
    %107 = arith.addf %106, %73 : vector<16x16xf32>
    %cst_33 = arith.constant dense<0xFF800000> : vector<16xf32>
    %108 = vector.multi_reduction <maximumf>, %107, %cst_33 [1] : vector<16x16xf32> to vector<16xf32>
    %109 = vector.shape_cast %108 : vector<16xf32> to vector<16x1xf32>
    %110 = vector.broadcast %109 : vector<16x1xf32> to vector<16x16xf32>
    %111 = arith.subf %107, %110 : vector<16x16xf32>
    %112 = math.exp %111 : vector<16x16xf32>
    %cst_34 = arith.constant dense<0.000000e+00> : vector<16xf32>
    %113 = vector.multi_reduction <add>, %112, %cst_34 [1] : vector<16x16xf32> to vector<16xf32>
    %114 = vector.shape_cast %113 : vector<16xf32> to vector<16x1xf32>
    %115 = tpu.reciprocal %114 {approx = true} : vector<16x1xf32> -> vector<16x1xf32>
    %116 = vector.broadcast %115 : vector<16x1xf32> to vector<16x16xf32>
    %117 = arith.mulf %112, %116 : vector<16x16xf32>
    %118 = arith.truncf %117 : vector<16x16xf32> to vector<16x16xbf16>
    %119 = arith.truncf %101 : vector<16x64xf32> to vector<16x64xbf16>
    %cst_35 = arith.constant dense<0.000000e+00> : vector<16x64xf32>
    %120 = tpu.matmul %118, %119, %cst_35 {dimension_numbers = #tpu.dot_dimension_numbers<[1], [0], [0], [1], [0, 0, 1, 1], [], []>} : vector<16x16xbf16>, vector<16x64xbf16>, vector<16x64xf32> -> vector<16x64xf32>
    %121 = arith.truncf %120 : vector<16x64xf32> to vector<16x64xbf16>
    %122 = vector.extract_strided_slice %13 {offsets = [64, 0], sizes = [64, 128], strides = [1, 1]} : vector<128x128xbf16> to vector<64x128xbf16>
    %cst_36 = arith.constant dense<0.000000e+00> : vector<16x128xf32>
    %123 = tpu.matmul %121, %122, %cst_36 {dimension_numbers = #tpu.dot_dimension_numbers<[1], [0], [0], [1], [0, 0, 1, 1], [], []>} : vector<16x64xbf16>, vector<64x128xbf16>, vector<16x128xf32> -> vector<16x128xf32>
    %124 = arith.addf %98, %123 : vector<16x128xf32>
    %125 = tpu.concatenate %69, %124 in 0 : vector<16x128xf32>, vector<16x128xf32> -> vector<32x128xf32>
    %c0_37 = arith.constant 0 : index
    %c0_38 = arith.constant 0 : index
    %c0_39 = arith.constant 0 : index
    %126 = vector.load %arg8[%c0_37, %c0_38, %c0_39] : memref<1x1x128xf32, #tpu.memory_space<vmem>>, vector<1x1x128xf32>
    %127 = vector.shape_cast %126 : vector<1x1x128xf32> to vector<1x128xf32>
    %128 = vector.broadcast %127 : vector<1x128xf32> to vector<32x128xf32>
    %129 = arith.addf %125, %128 : vector<32x128xf32>
    %130 = arith.addf %129, %3 : vector<32x128xf32>
    %c0_40 = arith.constant 0 : index
    %c0_41 = arith.constant 0 : index
    %c0_42 = arith.constant 0 : index
    %131 = vector.load %arg9[%c0_40, %c0_41, %c0_42] : memref<1x1x128xf32, #tpu.memory_space<vmem>>, vector<1x1x128xf32>
    %132 = vector.shape_cast %131 : vector<1x1x128xf32> to vector<1x128xf32>
    %c0_43 = arith.constant 0 : index
    %c0_44 = arith.constant 0 : index
    %c0_45 = arith.constant 0 : index
    %133 = vector.load %arg10[%c0_43, %c0_44, %c0_45] : memref<1x1x128xf32, #tpu.memory_space<vmem>>, vector<1x1x128xf32>
    %134 = vector.shape_cast %133 : vector<1x1x128xf32> to vector<1x128xf32>
    %cst_46 = arith.constant dense<0.000000e+00> : vector<32xf32>
    %135 = vector.multi_reduction <add>, %130, %cst_46 [1] : vector<32x128xf32> to vector<32xf32>
    %136 = vector.shape_cast %135 : vector<32xf32> to vector<32x1xf32>
    %cst_47 = arith.constant 1.280000e+02 : f32
    %137 = vector.broadcast %cst_47 : f32 to vector<32x1xf32>
    %138 = arith.divf %136, %137 : vector<32x1xf32>
    %139 = vector.broadcast %138 : vector<32x1xf32> to vector<32x128xf32>
    %140 = arith.subf %130, %139 : vector<32x128xf32>
    %141 = arith.mulf %140, %140 : vector<32x128xf32>
    %cst_48 = arith.constant dense<0.000000e+00> : vector<32xf32>
    %142 = vector.multi_reduction <add>, %141, %cst_48 [1] : vector<32x128xf32> to vector<32xf32>
    %143 = vector.shape_cast %142 : vector<32xf32> to vector<32x1xf32>
    %cst_49 = arith.constant 1.280000e+02 : f32
    %144 = vector.broadcast %cst_49 : f32 to vector<32x1xf32>
    %145 = arith.divf %143, %144 : vector<32x1xf32>
    %146 = vector.broadcast %138 : vector<32x1xf32> to vector<32x128xf32>
    %147 = arith.subf %130, %146 : vector<32x128xf32>
    %cst_50 = arith.constant 9.99999996E-13 : f32
    %148 = vector.broadcast %cst_50 : f32 to vector<32x1xf32>
    %149 = arith.addf %145, %148 : vector<32x1xf32>
    %150 = math.rsqrt %149 : vector<32x1xf32>
    %151 = vector.broadcast %150 : vector<32x1xf32> to vector<32x128xf32>
    %152 = arith.mulf %147, %151 : vector<32x128xf32>
    %153 = vector.broadcast %132 : vector<1x128xf32> to vector<32x128xf32>
    %154 = arith.mulf %152, %153 : vector<32x128xf32>
    %155 = vector.broadcast %134 : vector<1x128xf32> to vector<32x128xf32>
    %156 = arith.addf %154, %155 : vector<32x128xf32>
    %157 = arith.truncf %156 : vector<32x128xf32> to vector<32x128xbf16>
    %c0_51 = arith.constant 0 : index
    %c0_52 = arith.constant 0 : index
    %c0_53 = arith.constant 0 : index
    %158 = vector.load %arg11[%c0_51, %c0_52, %c0_53] : memref<1x128x256xbf16, #tpu.memory_space<vmem>>, vector<1x128x256xbf16>
    %159 = vector.shape_cast %158 : vector<1x128x256xbf16> to vector<128x256xbf16>
    %cst_54 = arith.constant dense<0.000000e+00> : vector<32x256xf32>
    %160 = tpu.matmul %157, %159, %cst_54 {dimension_numbers = #tpu.dot_dimension_numbers<[1], [0], [0], [1], [0, 0, 1, 1], [], []>} : vector<32x128xbf16>, vector<128x256xbf16>, vector<32x256xf32> -> vector<32x256xf32>
    %c0_55 = arith.constant 0 : index
    %c0_56 = arith.constant 0 : index
    %c0_57 = arith.constant 0 : index
    %161 = vector.load %arg12[%c0_55, %c0_56, %c0_57] : memref<1x1x256xf32, #tpu.memory_space<vmem>>, vector<1x1x256xf32>
    %162 = vector.shape_cast %161 : vector<1x1x256xf32> to vector<1x256xf32>
    %163 = vector.broadcast %162 : vector<1x256xf32> to vector<32x256xf32>
    %164 = arith.addf %160, %163 : vector<32x256xf32>
    %165 = arith.mulf %164, %164 : vector<32x256xf32>
    %166 = arith.mulf %164, %165 : vector<32x256xf32>
    %cst_58 = arith.constant 4.471500e-02 : f32
    %167 = vector.broadcast %cst_58 : f32 to vector<32x256xf32>
    %168 = arith.mulf %167, %166 : vector<32x256xf32>
    %169 = arith.addf %164, %168 : vector<32x256xf32>
    %cst_59 = arith.constant 0.797884583 : f32
    %170 = vector.broadcast %cst_59 : f32 to vector<32x256xf32>
    %171 = arith.mulf %170, %169 : vector<32x256xf32>
    %172 = math.tanh %171 : vector<32x256xf32>
    %cst_60 = arith.constant 1.000000e+00 : f32
    %173 = vector.broadcast %cst_60 : f32 to vector<32x256xf32>
    %174 = arith.addf %173, %172 : vector<32x256xf32>
    %cst_61 = arith.constant 5.000000e-01 : f32
    %175 = vector.broadcast %cst_61 : f32 to vector<32x256xf32>
    %176 = arith.mulf %175, %174 : vector<32x256xf32>
    %177 = arith.mulf %164, %176 : vector<32x256xf32>
    %178 = arith.truncf %177 : vector<32x256xf32> to vector<32x256xbf16>
    %c0_62 = arith.constant 0 : index
    %c0_63 = arith.constant 0 : index
    %c0_64 = arith.constant 0 : index
    %179 = vector.load %arg13[%c0_62, %c0_63, %c0_64] : memref<1x256x128xbf16, #tpu.memory_space<vmem>>, vector<1x256x128xbf16>
    %180 = vector.shape_cast %179 : vector<1x256x128xbf16> to vector<256x128xbf16>
    %cst_65 = arith.constant dense<0.000000e+00> : vector<32x128xf32>
    %181 = tpu.matmul %178, %180, %cst_65 {dimension_numbers = #tpu.dot_dimension_numbers<[1], [0], [0], [1], [0, 0, 1, 1], [], []>} : vector<32x256xbf16>, vector<256x128xbf16>, vector<32x128xf32> -> vector<32x128xf32>
    %c0_66 = arith.constant 0 : index
    %c0_67 = arith.constant 0 : index
    %c0_68 = arith.constant 0 : index
    %182 = vector.load %arg14[%c0_66, %c0_67, %c0_68] : memref<1x1x128xf32, #tpu.memory_space<vmem>>, vector<1x1x128xf32>
    %183 = vector.shape_cast %182 : vector<1x1x128xf32> to vector<1x128xf32>
    %184 = vector.broadcast %183 : vector<1x128xf32> to vector<32x128xf32>
    %185 = arith.addf %181, %184 : vector<32x128xf32>
    %186 = arith.addf %185, %156 : vector<32x128xf32>
    %c0_69 = arith.constant 0 : index
    %c0_70 = arith.constant 0 : index
    %c0_71 = arith.constant 0 : index
    %187 = vector.load %arg15[%c0_69, %c0_70, %c0_71] : memref<1x1x128xf32, #tpu.memory_space<vmem>>, vector<1x1x128xf32>
    %188 = vector.shape_cast %187 : vector<1x1x128xf32> to vector<1x128xf32>
    %c0_72 = arith.constant 0 : index
    %c0_73 = arith.constant 0 : index
    %c0_74 = arith.constant 0 : index
    %189 = vector.load %arg16[%c0_72, %c0_73, %c0_74] : memref<1x1x128xf32, #tpu.memory_space<vmem>>, vector<1x1x128xf32>
    %190 = vector.shape_cast %189 : vector<1x1x128xf32> to vector<1x128xf32>
    %cst_75 = arith.constant dense<0.000000e+00> : vector<32xf32>
    %191 = vector.multi_reduction <add>, %186, %cst_75 [1] : vector<32x128xf32> to vector<32xf32>
    %192 = vector.shape_cast %191 : vector<32xf32> to vector<32x1xf32>
    %cst_76 = arith.constant 1.280000e+02 : f32
    %193 = vector.broadcast %cst_76 : f32 to vector<32x1xf32>
    %194 = arith.divf %192, %193 : vector<32x1xf32>
    %195 = vector.broadcast %194 : vector<32x1xf32> to vector<32x128xf32>
    %196 = arith.subf %186, %195 : vector<32x128xf32>
    %197 = arith.mulf %196, %196 : vector<32x128xf32>
    %cst_77 = arith.constant dense<0.000000e+00> : vector<32xf32>
    %198 = vector.multi_reduction <add>, %197, %cst_77 [1] : vector<32x128xf32> to vector<32xf32>
    %199 = vector.shape_cast %198 : vector<32xf32> to vector<32x1xf32>
    %cst_78 = arith.constant 1.280000e+02 : f32
    %200 = vector.broadcast %cst_78 : f32 to vector<32x1xf32>
    %201 = arith.divf %199, %200 : vector<32x1xf32>
    %202 = vector.broadcast %194 : vector<32x1xf32> to vector<32x128xf32>
    %203 = arith.subf %186, %202 : vector<32x128xf32>
    %cst_79 = arith.constant 9.99999996E-13 : f32
    %204 = vector.broadcast %cst_79 : f32 to vector<32x1xf32>
    %205 = arith.addf %201, %204 : vector<32x1xf32>
    %206 = math.rsqrt %205 : vector<32x1xf32>
    %207 = vector.broadcast %206 : vector<32x1xf32> to vector<32x128xf32>
    %208 = arith.mulf %203, %207 : vector<32x128xf32>
    %209 = vector.broadcast %188 : vector<1x128xf32> to vector<32x128xf32>
    %210 = arith.mulf %208, %209 : vector<32x128xf32>
    %211 = vector.broadcast %190 : vector<1x128xf32> to vector<32x128xf32>
    %212 = arith.addf %210, %211 : vector<32x128xf32>
    %c0_80 = arith.constant 0 : index
    %c0_81 = arith.constant 0 : index
    %213 = vector.load %arg22[%c0_80, %c0_81] : memref<32x128xf32, #tpu.memory_space<vmem>>, vector<32x128xf32>
    tpu.vector_store %arg22[%c0_80, %c0_81], %212 {strides = array<i32>} : memref<32x128xf32, #tpu.memory_space<vmem>>, vector<32x128xf32>,
    %c1_i32 = arith.constant 1 : i32
    %214 = arith.cmpi eq, %arg0, %c1_i32 : i32
    %215 = arith.extui %214 : i1 to i32
    %c0_i32_82 = arith.constant 0 : i32
    %216 = arith.cmpi ne, %215, %c0_i32_82 : i32
    scf.if %216 {
      %217 = vector.extract_strided_slice %212 {offsets = [0, 0], sizes = [1, 128], strides = [1, 1]} : vector<32x128xf32> to vector<1x128xf32>
      %218 = vector.extract_strided_slice %212 {offsets = [16, 0], sizes = [1, 128], strides = [1, 1]} : vector<32x128xf32> to vector<1x128xf32>
      %219 = tpu.concatenate %217, %218 in 0 : vector<1x128xf32>, vector<1x128xf32> -> vector<2x128xf32>
      %220 = arith.truncf %219 : vector<2x128xf32> to vector<2x128xbf16>
      %c0_83 = arith.constant 0 : index
      %c0_84 = arith.constant 0 : index
      %221 = vector.load %arg17[%c0_83, %c0_84] : memref<128x128xbf16, #tpu.memory_space<vmem>>, vector<128x128xbf16>
      %cst_85 = arith.constant dense<0.000000e+00> : vector<2x128xf32>
      %222 = tpu.matmul %220, %221, %cst_85 {dimension_numbers = #tpu.dot_dimension_numbers<[1], [0], [0], [1], [0, 0, 1, 1], [], []>} : vector<2x128xbf16>, vector<128x128xbf16>, vector<2x128xf32> -> vector<2x128xf32>
      %c0_86 = arith.constant 0 : index
      %c0_87 = arith.constant 0 : index
      %223 = vector.load %arg18[%c0_86, %c0_87] : memref<1x128xf32, #tpu.memory_space<vmem>>, vector<1x128xf32>
      %224 = vector.broadcast %223 : vector<1x128xf32> to vector<2x128xf32>
      %225 = arith.addf %222, %224 : vector<2x128xf32>
      %226 = math.tanh %225 : vector<2x128xf32>
      %227 = arith.truncf %226 : vector<2x128xf32> to vector<2x128xbf16>
      %c0_88 = arith.constant 0 : index
      %c0_89 = arith.constant 0 : index
      %228 = vector.load %arg19[%c0_88, %c0_89] : memref<128x128xbf16, #tpu.memory_space<vmem>>, vector<128x128xbf16>
      %cst_90 = arith.constant dense<0.000000e+00> : vector<2x128xf32>
      %229 = tpu.matmul %227, %228, %cst_90 {dimension_numbers = #tpu.dot_dimension_numbers<[1], [0], [0], [1], [0, 0, 1, 1], [], []>} : vector<2x128xbf16>, vector<128x128xbf16>, vector<2x128xf32> -> vector<2x128xf32>
      %c0_91 = arith.constant 0 : index
      %c0_92 = arith.constant 0 : index
      %230 = vector.load %arg20[%c0_91, %c0_92] : memref<1x128xf32, #tpu.memory_space<vmem>>, vector<1x128xf32>
      %231 = vector.broadcast %230 : vector<1x128xf32> to vector<2x128xf32>
      %232 = arith.addf %229, %231 : vector<2x128xf32>
      %c0_93 = arith.constant 0 : index
      %c0_94 = arith.constant 0 : index
      %233 = vector.load %arg21[%c0_93, %c0_94] : memref<2x128xf32, #tpu.memory_space<vmem>>, vector<2x128xf32>
      tpu.vector_store %arg21[%c0_93, %c0_94], %232 {strides = array<i32>} : memref<2x128xf32, #tpu.memory_space<vmem>>, vector<2x128xf32>,
    } else {
    }
    return
  }
  func.func @transform_0(%arg0: i32) -> (i32, i32) {
    %c0_i32 = arith.constant 0 : i32
    %c0_i32_0 = arith.constant 0 : i32
    %c0_i32_1 = arith.constant 0 : i32
    return %c0_i32, %c0_i32_0 : i32, i32
  }
  func.func @transform_1(%arg0: i32) -> (i32, i32) {
    %c0_i32 = arith.constant 0 : i32
    %c0_i32_0 = arith.constant 0 : i32
    %c0_i32_1 = arith.constant 0 : i32
    return %c0_i32, %c0_i32_0 : i32, i32
  }
  func.func @transform_2(%arg0: i32) -> (i32, i32) {
    %c0_i32 = arith.constant 0 : i32
    %c0_i32_0 = arith.constant 0 : i32
    %c0_i32_1 = arith.constant 0 : i32
    return %c0_i32, %c0_i32_0 : i32, i32
  }
  func.func @transform_3(%arg0: i32) -> (i32, i32) {
    %c0_i32 = arith.constant 0 : i32
    %c0_i32_0 = arith.constant 0 : i32
    %c0_i32_1 = arith.constant 0 : i32
    return %c0_i32, %c0_i32_0 : i32, i32
  }
  func.func @transform_4(%arg0: i32) -> (i32, i32, i32) {
    %c0_i32 = arith.constant 0 : i32
    %c0_i32_0 = arith.constant 0 : i32
    %c0_i32_1 = arith.constant 0 : i32
    return %arg0, %c0_i32, %c0_i32_0 : i32, i32, i32
  }
  func.func @transform_5(%arg0: i32) -> (i32, i32, i32) {
    %c0_i32 = arith.constant 0 : i32
    %c0_i32_0 = arith.constant 0 : i32
    %c0_i32_1 = arith.constant 0 : i32
    return %arg0, %c0_i32, %c0_i32_0 : i32, i32, i32
  }
  func.func @transform_6(%arg0: i32) -> (i32, i32, i32) {
    %c0_i32 = arith.constant 0 : i32
    %c0_i32_0 = arith.constant 0 : i32
    %c0_i32_1 = arith.constant 0 : i32
    return %arg0, %c0_i32, %c0_i32_0 : i32, i32, i32
  }
  func.func @transform_7(%arg0: i32) -> (i32, i32, i32) {
    %c0_i32 = arith.constant 0 : i32
    %c0_i32_0 = arith.constant 0 : i32
    %c0_i32_1 = arith.constant 0 : i32
    return %arg0, %c0_i32, %c0_i32_0 : i32, i32, i32
  }
  func.func @transform_8(%arg0: i32) -> (i32, i32, i32) {
    %c0_i32 = arith.constant 0 : i32
    %c0_i32_0 = arith.constant 0 : i32
    %c0_i32_1 = arith.constant 0 : i32
    return %arg0, %c0_i32, %c0_i32_0 : i32, i32, i32
  }
  func.func @transform_9(%arg0: i32) -> (i32, i32, i32) {
    %c0_i32 = arith.constant 0 : i32
    %c0_i32_0 = arith.constant 0 : i32
    %c0_i32_1 = arith.constant 0 : i32
    return %arg0, %c0_i32, %c0_i32_0 : i32, i32, i32
  }
  func.func @transform_10(%arg0: i32) -> (i32, i32, i32) {
    %c0_i32 = arith.constant 0 : i32
    %c0_i32_0 = arith.constant 0 : i32
    %c0_i32_1 = arith.constant 0 : i32
    return %arg0, %c0_i32, %c0_i32_0 : i32, i32, i32
  }
  func.func @transform_11(%arg0: i32) -> (i32, i32, i32) {
    %c0_i32 = arith.constant 0 : i32
    %c0_i32_0 = arith.constant 0 : i32
    %c0_i32_1 = arith.constant 0 : i32
    return %arg0, %c0_i32, %c0_i32_0 : i32, i32, i32
  }
  func.func @transform_12(%arg0: i32) -> (i32, i32, i32) {
    %c0_i32 = arith.constant 0 : i32
    %c0_i32_0 = arith.constant 0 : i32
    %c0_i32_1 = arith.constant 0 : i32
    return %arg0, %c0_i32, %c0_i32_0 : i32, i32, i32
  }
  func.func @transform_13(%arg0: i32) -> (i32, i32, i32) {
    %c0_i32 = arith.constant 0 : i32
    %c0_i32_0 = arith.constant 0 : i32
    %c0_i32_1 = arith.constant 0 : i32
    return %arg0, %c0_i32, %c0_i32_0 : i32, i32, i32
  }
  func.func @transform_14(%arg0: i32) -> (i32, i32, i32) {
    %c0_i32 = arith.constant 0 : i32
    %c0_i32_0 = arith.constant 0 : i32
    %c0_i32_1 = arith.constant 0 : i32
    return %arg0, %c0_i32, %c0_i32_0 : i32, i32, i32
  }
  func.func @transform_15(%arg0: i32) -> (i32, i32, i32) {
    %c0_i32 = arith.constant 0 : i32
    %c0_i32_0 = arith.constant 0 : i32
    %c0_i32_1 = arith.constant 0 : i32
    return %arg0, %c0_i32, %c0_i32_0 : i32, i32, i32
  }
  func.func @transform_16(%arg0: i32) -> (i32, i32) {
    %c0_i32 = arith.constant 0 : i32
    %c0_i32_0 = arith.constant 0 : i32
    %c0_i32_1 = arith.constant 0 : i32
    return %c0_i32, %c0_i32_0 : i32, i32
  }
  func.func @transform_17(%arg0: i32) -> (i32, i32) {
    %c0_i32 = arith.constant 0 : i32
    %c0_i32_0 = arith.constant 0 : i32
    %c0_i32_1 = arith.constant 0 : i32
    return %c0_i32, %c0_i32_0 : i32, i32
  }
  func.func @transform_18(%arg0: i32) -> (i32, i32) {
    %c0_i32 = arith.constant 0 : i32
    %c0_i32_0 = arith.constant 0 : i32
    %c0_i32_1 = arith.constant 0 : i32
    return %c0_i32, %c0_i32_0 : i32, i32
  }
  func.func @transform_19(%arg0: i32) -> (i32, i32) {
    %c0_i32 = arith.constant 0 : i32
    %c0_i32_0 = arith.constant 0 : i32
    %c0_i32_1 = arith.constant 0 : i32
    return %c0_i32, %c0_i32_0 : i32, i32
  }
  func.func @transform_20(%arg0: i32) -> (i32, i32) {
    %c0_i32 = arith.constant 0 : i32
    %c0_i32_0 = arith.constant 0 : i32
    %c0_i32_1 = arith.constant 0 : i32
    return %c0_i32, %c0_i32_0 : i32, i32
  }
}

</mosaic_0001>

<bundles_post_ra>
// kernel: bert_classifier_forward.1
= control target key start
LH: loop header
LB: loop body
LE: loop exit
PB: predicated region body
PF: predicated region fallthrough
CT: control target
= control target key end

     0   :  { %s5086_s0 = inlined_call_operand.vmem [shape: f32[32,128], index: 0, kind: input, shape index: {}]   ;;  %s5087_s1 = inlined_call_operand.vmem [shape: f32[2,16], index: 1, kind: input, shape index: {}]   ;;  %s5088_s2 = inlined_call_operand.vmem [shape: f32[1,128], index: 2, kind: input, shape index: {}]   ;;  %s5089_s3 = inlined_call_operand.hbm [shape: f32[1,128], index: 3, kind: input, shape index: {}]   ;;  %s5090_s4 = inlined_call_operand.vmem [shape: bf16[2,128,384], index: 4, kind: input, shape index: {}]   ;;  %s5091_s5 = inlined_call_operand.vmem [shape: f32[2,1,384], index: 5, kind: input, shape index: {}]   ;;  %s5092_s6 = inlined_call_operand.hbm [shape: bf16[2,128,128], index: 6, kind: input, shape index: {}]   ;;  %s5093_s7 = inlined_call_operand.vmem [shape: f32[2,1,128], index: 7, kind: input, shape index: {}]   ;;  %s5094_s8 = inlined_call_operand.hbm [shape: f32[2,1,128], index: 8, kind: input, shape index: {}]   ;;  %s5095_s9 = inlined_call_operand.hbm [shape: f32[2,1,128], index: 9, kind: input, shape index: {}]   ;;  %s5096_s10 = inlined_call_operand.hbm [shape: bf16[2,128,256], index: 10, kind: input, shape index: {}]   ;;  %s5097_s11 = inlined_call_operand.vmem [shape: f32[2,1,256], index: 11, kind: input, shape index: {}]   ;;  %s5098_s12 = inlined_call_operand.hbm [shape: bf16[2,256,128], index: 12, kind: input, shape index: {}]   ;;  %s5099_s13 = inlined_call_operand.vmem [shape: f32[2,1,128], index: 13, kind: input, shape index: {}]   ;;  %s5100_s14 = inlined_call_operand.hbm [shape: f32[2,1,128], index: 14, kind: input, shape index: {}]   ;;  %s5101_s15 = inlined_call_operand.hbm [shape: f32[2,1,128], index: 15, kind: input, shape index: {}]   ;;  %s5102_s16 = inlined_call_operand.vmem [shape: bf16[128,128], index: 16, kind: input, shape index: {}]   ;;  %s5103_s17 = inlined_call_operand.hbm [shape: f32[1,128], index: 17, kind: input, shape index: {}]   ;;  %s5104_s18 = inlined_call_operand.vmem [shape: bf16[128,128], index: 18, kind: input, shape index: {}]   ;;  %s5105_s19 = inlined_call_operand.vmem [shape: f32[1,128], index: 19, kind: input, shape index: {}]   ;;  %s5106_s20 = inlined_call_operand.hbm [shape: f32[2,128], index: 20, kind: output, shape index: {}]  }
   0x1   :  { %5133 = sst [smem:[#allocation30_spill]] %s5086_s0 }
   0x2   :  { %5134 = sst [smem:[#allocation31_spill]] %s5087_s1 }
   0x3   :  { %5135 = sst [smem:[#allocation32_spill]] %s5088_s2 }
   0x4   :  { %5136 = sst [smem:[#allocation33_spill]] %s5089_s3 }
   0x5   :  { %5137 = sst [smem:[#allocation34_spill]] %s5090_s4 }
   0x6   :  { %5138 = sst [smem:[#allocation35_spill]] %s5091_s5 }
   0x7   :  { %5139 = sst [smem:[#allocation36_spill]] %s5092_s6 }
   0x8   :  { %5140 = sst [smem:[#allocation37_spill]] %s5093_s7 }
   0x9   :  { %5141 = sst [smem:[#allocation38_spill]] %s5094_s8 }
   0xa   :  { %5142 = sst [smem:[#allocation39_spill]] %s5095_s9 }
   0xb   :  { %5143 = sst [smem:[#allocation40_spill]] %s5097_s11 }
   0xc   :  { %5144 = sst [smem:[#allocation41_spill]] %s5098_s12 }
   0xd   :  { %5145 = sst [smem:[#allocation42_spill]] %s5099_s13 }
   0xe   :  { %5146 = sst [smem:[#allocation43_spill]] %s5102_s16 }
   0xf   :  { %5147 = sst [smem:[#allocation44_spill]] %s5103_s17 }
  0x10   :  { %5148 = sst [smem:[#allocation45_spill]] %s5104_s18 }
  0x11   :  { %5149 = sst [smem:[#allocation46_spill]] %s5105_s19 }
  0x12   :  { %5150 = sst [smem:[#allocation47_spill]] %s5106_s20 }
  0x13   :  { %25 = vsyncpa [#allocation4], 0 }
  0x14   :  { %26 = vsyncpa [#allocation7], 0 }
  0x15   :  { %28 = vsyncpa [#allocation7 + $0x1], 0 }
  0x16   :  { %29 = vsyncpa [#allocation10], 0 }
  0x17   :  { %31 = vsyncpa [#allocation10 + $0x1], 0 }
  0x18   :  { %32 = vsyncpa [#allocation13], 0 }
  0x19   :  { %34 = vsyncpa [#allocation13 + $0x1], 0 }
  0x1a   :  { %35 = vsyncpa [#allocation16], 0 }
  0x1b   :  { %37 = vsyncpa [#allocation16 + $0x1], 0 }
  0x1c   :  { %38 = vsyncpa [#allocation5], 0  ;;  %s4272_s1 = smov 0   ;;  %s4274_s22 = smov 0  }
  0x1d   :  { %s4276_s23 = smov 0   ;;  %s4278_s24 = smov 0  }
  0x1e LB: > { %5151 = sst [smem:[#allocation26_spill]] %s4141_s23  ;;  %s4291_s2 = sadd.s32 4294967295, %s4145_s24   ;;  %s4145_s24 = sphi %s4278_s24, %s5207_s24   ;;  %s4141_s23 = sphi %s4276_s23, %s5209_s23   ;;  %s4137_s22 = sphi %s4274_s22, %s5211_s22   ;;  %s4133_s1 = sphi %s4272_s1, %s5210_s1  }
  0x1f   : > { %s4294_s25 = sadd.s32 1, %s4145_s24   ;;  %s187_s26 = sadd.s32 1, %s4141_s23 }
  0x20   : > { %5152 = sst [smem:[#allocation27_spill]] %s4294_s25  ;;  %s184_s3 = ssub.s32 %s4145_s24, %s4294_s25 }
  0x21   : > { %p185_p0 = scmp.eq.s32.totalorder %s184_s3, 0  ;;  %p194_p1 = scmp.ne.s32.totalorder %s4141_s23, %s4137_s22 }
  0x22   : > { %p195_p2 = scmp.eq.s32.totalorder %s4145_s24, 0  ;;  %p200_p3 = scmp.ne.s32.totalorder %s4137_s22, %s4133_s1 }
  0x23   : > { %s4304_s27 = scalar_select %p185_p0, %s4141_s23, %s187_s26  }
  0x24   : > { %p4306_p4 = por %p195_p2, %p194_p1  ;;  %p5115_p5 = scmp.eq.s32.totalorder %s4291_s2, 0 }
  0x25   : > { %5153 = sst [smem:[#allocation28_spill]] %s4304_s27  ;;  %p3132_p6 = scmp.ge.s32.totalorder %s4145_s24, 1 }
  0x26   : > { %p550_p7 = scmp.lt.s32.totalorder %s4145_s24, 3  ;;  %p4315_p8 = por %p5115_p5, %p200_p3 }
  0x27   : > { %s4147_s30 = smov [#allocation17]   ;;  %p3575_p12 = scmp.lt.s32.totalorder %s4145_s24, 2 }
  0x28   : > { %s5155_s4 = scalar_select %p4315_p8, 1, 0 }
  0x29   : > { %p4320_p10 = pnand %p3132_p6, %p550_p7  ;;  %s586_s0 = sshll.u32 %s4147_s30, 4  ;;  %s587_s0 = int_to_ptr.vmem [resolvable:$true] %s586_s0 }
  0x2a   : > { %5156 = sst [smem:[#allocation29_spill]] %s5155_s4  ;;  %s4328_s21 = sand.u32 1, %s4145_s24  }
  0x2b   : > { %s5157_s29 = scalar_select %p4320_p10, 1, 0 }
  0x2c   : > { %p3544_p11 = pneg %p4320_p10  ;;  %p4338_p0 = pnand %p3575_p12, %p4306_p4 }
  0x2d   : > { %s4343_s26 = sand.u32 1, %s4141_s23   ;;  %s5160_s17 = sld [smem:[#allocation44_spill]] }
  0x2e   : > { %p4332_p13 = pnand %p3544_p11, %p5115_p5  ;;  %s3136_s30 = sshll.u32 %s4343_s26, 6 }
  0x2f   : > { %s5159_s3 = scalar_select %p4338_p0, 1, 0 }
  0x30   : > { %s5158_s1 = scalar_select %p4332_p13, 1, 0 }
  0x31   : > { %p5119_p2 = pneg %p4332_p13 }
  0x33   : > { %s3795_s20 = scalar_lea.hbm %s5160_s17, 16 }
  0x34   : > { %p3796_p1 = scmp.ne.s32.totalorder %s5160_s17, %s3795_s20  ;;  %p3802_p6 = scmp.lt.u32.totalorder %s3795_s20, %s5160_s17 }
  0x36   : > { %p3798_p3 = pnand %p5119_p2, %p3796_p1 }
  0x38   : > { %p3799_p4 = pneg %p3798_p3 }
  0x3a   : > { %p3804_p7 = pnand %p3802_p6, %p3799_p4 }
  0x3c   : > { %3807 = shalt.err (!%p3804_p7)
}
  0x3d   : > { %s3808_s23 = scalar_lea.vmem %s587_s0, 16  ;;  %s3815_s18 = scalar_lea.vmem %s587_s0, 32 }
  0x3e   : > { %p3809_p11 = scmp.ne.s32.totalorder %s587_s0, %s3808_s23  ;;  %p3816_p5 = scmp.lt.s32.totalorder %s587_s0, %s587_s0 }
  0x3f   : > { %p3817_p8 = scmp.lt.s32.totalorder %s3815_s18, %s3808_s23 }
  0x40   : > { %p3811_p12 = pnand %p3809_p11, %p5119_p2 }
  0x41   : > { %p3818_p10 = por %p3817_p8, %p3816_p5 }
  0x42   : > { %p3812_p9 = pneg %p3811_p12 }
  0x44   : > { %p3819_p0 = pnand %p3818_p10, %p3812_p9 }
  0x46   : > { %3822 = shalt.err (!%p3819_p0)
}
  0x47   : > { %3550 = dma.hbm_to_vmem [thread:$0]  (!%p4332_p13), %s5160_s17, 16, %s587_s0, [#allocation16]  }
  0x48   : > { %s3265_s20 = sshll.u32 %s4145_s24, 10  ;;  %s622_s25 = scalar_lea.vmem [#allocation6], %s3136_s30 }
  0x49   : > { %s629_s27 = sshll.u32 %s622_s25, 4  ;;  %s5161_s6 = sld [smem:[#allocation36_spill]]  ;;  %s4374_s27 = int_to_ptr.vmem [resolvable:$true] %s629_s27 }
  0x4a   : > { %s5122_s23 = scalar_lea.sflag [#allocation7], %s4328_s21  ;;  %p5162_p8 = scmp.ne.s32.totalorder %s5159_s3, 0 }
  0x4c   : > { %p4381_p9 = pneg %p5162_p8 }
  0x4e   : > { %s5163_s0 = scalar_select %p4381_p9, 1, 0 }
  0x4f   : > { %s4372_s5 = scalar_lea.hbm %s5161_s6, %s3265_s20  ;;  %s3828_s19 = scalar_lea.hbm %s5161_s6, 2048 }
  0x50   : > { %s3823_s18 = scalar_lea.hbm %s4372_s5, 1024  ;;  %p3829_p1 = scmp.lt.u32.totalorder %s4372_s5, %s5161_s6 }
  0x51   : > { %p3824_p5 = scmp.ne.s32.totalorder %s4372_s5, %s3823_s18  ;;  %p3830_p3 = scmp.lt.u32.totalorder %s3828_s19, %s3823_s18 }
  0x52   : > { %p3832_p6 = scmp.lt.u32.totalorder %s3823_s18, %s4372_s5 }
  0x53   : > { %p3826_p10 = pnand %p4381_p9, %p3824_p5  ;;  %p3831_p4 = por %p3830_p3, %p3829_p1 }
  0x55   : > { %p3827_p0 = pneg %p3826_p10  ;;  %p3833_p7 = por %p3832_p6, %p3831_p4 }
  0x57   : > { %p3834_p11 = pnand %p3833_p7, %p3827_p0 }
  0x59   : > { %3837 = shalt.err (!%p3834_p11)
}
  0x5a   : > { %s3838_s25 = scalar_lea.vmem %s4374_s27, 1024  ;;  %s4148_s28 = smov [#allocation6]  }
  0x5b   : > { %p3839_p12 = scmp.ne.s32.totalorder %s4374_s27, %s3838_s25  ;;  %s3843_s13 = sshll.u32 %s4148_s28, 4  ;;  %s3844_s13 = int_to_ptr.vmem [resolvable:$false] %s3843_s13 }
  0x5c   : > { %s3845_s30 = scalar_lea.vmem %s3844_s13, 2048  ;;  %p3846_p2 = scmp.lt.s32.totalorder %s4374_s27, %s3844_s13 }
  0x5d   : > { %p3841_p5 = pnand %p3839_p12, %p4381_p9  ;;  %p3847_p13 = scmp.lt.s32.totalorder %s3845_s30, %s3838_s25 }
  0x5f   : > { %p3842_p10 = pneg %p3841_p5  ;;  %p3848_p1 = por %p3847_p13, %p3846_p2 }
  0x61   : > { %p3849_p3 = pnand %p3848_p1, %p3842_p10 }
  0x63   : > { %3852 = shalt.err (!%p3849_p3)
}
  0x64   : > { %s5123_s18 = smov 64   ;;  %s5124_s19 = smov 4  }
  0x65   : > { %3554 = dma.hbm_to_vmem [thread:$0]  (!%p5162_p8), %s4372_s5, 1024, %s4374_s27, %s5122_s23, %s5123_s18, %s5123_s18, %s5124_s19  }
  0x66   : > { %s4410_s16 = sshll.u32 %s4145_s24, 4  ;;  %s5164_s9 = sld [smem:[#allocation39_spill]] }
  0x67   : > { %s665_s13 = scalar_lea.vmem [#allocation9], %s4343_s26  ;;  %s3141_s6 = sshll.u32 %s4343_s26, 7 }
  0x68   : > { %s672_s30 = sshll.u32 %s665_s13, 4  ;;  %s5126_s17 = scalar_lea.sflag [#allocation10], %s4328_s21  ;;  %s673_s30 = int_to_ptr.vmem [resolvable:$true] %s672_s30 }
  0x6c   : > { %s4416_s28 = scalar_lea.hbm %s5164_s9, %s4410_s16  ;;  %s3858_s20 = scalar_lea.hbm %s5164_s9, 32 }
  0x6d   : > { %s3853_s11 = scalar_lea.hbm %s4416_s28, 16  ;;  %p3859_p4 = scmp.lt.u32.totalorder %s4416_s28, %s5164_s9 }
  0x6e   : > { %p3854_p13 = scmp.ne.s32.totalorder %s4416_s28, %s3853_s11  ;;  %p3860_p6 = scmp.lt.u32.totalorder %s3858_s20, %s3853_s11 }
  0x6f   : > { %p3862_p11 = scmp.lt.u32.totalorder %s3853_s11, %s4416_s28 }
  0x70   : > { %p3856_p2 = pnand %p3854_p13, %p4381_p9  ;;  %p3861_p7 = por %p3860_p6, %p3859_p4 }
  0x72   : > { %p3857_p0 = pneg %p3856_p2  ;;  %p3863_p12 = por %p3862_p11, %p3861_p7 }
  0x74   : > { %p3864_p5 = pnand %p3863_p12, %p3857_p0 }
  0x76   : > { %3867 = shalt.err (!%p3864_p5)
}
  0x77   : > { %s3868_s13 = scalar_lea.vmem %s673_s30, 16  ;;  %s4151_s18 = smov [#allocation9]  }
  0x78   : > { %p3869_p10 = scmp.ne.s32.totalorder %s673_s30, %s3868_s13  ;;  %s3873_s19 = sshll.u32 %s4151_s18, 4  ;;  %s3874_s19 = int_to_ptr.vmem [resolvable:$false] %s3873_s19 }
  0x79   : > { %s3875_s5 = scalar_lea.vmem %s3874_s19, 32  ;;  %p3876_p13 = scmp.lt.s32.totalorder %s673_s30, %s3874_s19 }
  0x7a   : > { %p3871_p1 = pnand %p3869_p10, %p4381_p9  ;;  %p3877_p2 = scmp.lt.s32.totalorder %s3875_s5, %s3868_s13 }
  0x7c   : > { %p3872_p3 = pneg %p3871_p1  ;;  %p3878_p8 = por %p3877_p2, %p3876_p13 }
  0x7e   : > { %p3879_p4 = pnand %p3878_p8, %p3872_p3 }
  0x80   : > { %3882 = shalt.err (!%p3879_p4)
}
  0x81   : > { %p5165_p6 = scmp.ne.s32.totalorder %s5159_s3, 0  ;;  %s3266_s11 = sshll.u32 %s4145_s24, 11 }
  0x82   : > { %s683_s23 = scalar_lea.vmem [#allocation11], %s3141_s6  ;;  %s4446_s20 = scalar_lea.hbm %s5096_s10, %s3266_s11 }
  0x83   : > { %3560 = dma.hbm_to_vmem [thread:$0]  (!%p5165_p6), %s4416_s28, 16, %s673_s30, %s5126_s17  }
  0x84   : > { %s690_s18 = sshll.u32 %s683_s23, 4  ;;  %s5166_s12 = sld [smem:[#allocation41_spill]]  ;;  %s4448_s18 = int_to_ptr.vmem [resolvable:$true] %s690_s18 }
  0x85   : > { %s711_s24 = scalar_lea.vmem [#allocation12], %s3141_s6  ;;  %s708_s30 = scalar_lea.sflag [#allocation13], %s4328_s21 }
  0x86   : > { %s718_s28 = sshll.u32 %s711_s24, 4  ;;  %s4457_s28 = int_to_ptr.vmem [resolvable:$true] %s718_s28 }
  0x8a   : > { %s4453_s5 = scalar_lea.hbm %s5166_s12, %s3266_s11  ;;  %s3888_s11 = scalar_lea.hbm %s5166_s12, 4096 }
  0x8b   : > { %s3883_s23 = scalar_lea.hbm %s4453_s5, 2048  ;;  %p3889_p11 = scmp.lt.u32.totalorder %s4453_s5, %s5166_s12 }
  0x8c   : > { %p3884_p8 = scmp.ne.s32.totalorder %s4453_s5, %s3883_s23  ;;  %p3890_p12 = scmp.lt.u32.totalorder %s3888_s11, %s3883_s23 }
  0x8d   : > { %p3892_p10 = scmp.lt.u32.totalorder %s3883_s23, %s4453_s5 }
  0x8e   : > { %p3886_p0 = pnand %p3884_p8, %p4381_p9  ;;  %p3891_p5 = por %p3890_p12, %p3889_p11 }
  0x90   : > { %p3887_p7 = pneg %p3886_p0  ;;  %p3893_p1 = por %p3892_p10, %p3891_p5 }
  0x92   : > { %p3894_p3 = pnand %p3893_p1, %p3887_p7 }
  0x94   : > { %3897 = shalt.err (!%p3894_p3)
}
  0x95   : > { %s3898_s6 = scalar_lea.vmem %s4457_s28, 2048  ;;  %s4152_s24 = smov [#allocation12]  }
  0x96   : > { %p3899_p13 = scmp.ne.s32.totalorder %s4457_s28, %s3898_s6  ;;  %s3903_s19 = sshll.u32 %s4152_s24, 4  ;;  %s3904_s19 = int_to_ptr.vmem [resolvable:$false] %s3903_s19 }
  0x97   : > { %s3905_s27 = scalar_lea.vmem %s3904_s19, 4096  ;;  %p3906_p8 = scmp.lt.s32.totalorder %s4457_s28, %s3904_s19 }
  0x98   : > { %p3901_p2 = pnand %p3899_p13, %p4381_p9  ;;  %p3907_p0 = scmp.lt.s32.totalorder %s3905_s27, %s3898_s6 }
  0x9a   : > { %p3902_p4 = pneg %p3901_p2  ;;  %p3908_p11 = por %p3907_p0, %p3906_p8 }
  0x9c   : > { %p3909_p12 = pnand %p3908_p11, %p3902_p4 }
  0x9e   : > { %3912 = shalt.err (!%p3909_p12)
}
  0x9f   : > { %s5167_s23 = smov 4   ;;  %s5168_s11 = smov 64  }
  0xa0   : > { %3566 = dma.hbm_to_vmem [thread:$0]  (!%p5165_p6), %s4453_s5, 2048, %s4457_s28, %s708_s30, %s5168_s11, %s5168_s11, %s5167_s23  }
  0xa1   : > { %s4153_s25 = smov [#allocation3]   ;;  %s5169_s8 = sld [smem:[#allocation38_spill]] }
  0xa2   : > { %s572_s13 = sshll.u32 %s4153_s25, 4  ;;  %s5170_s9 = sld [smem:[#allocation33_spill]]  ;;  %s573_s13 = int_to_ptr.vmem [resolvable:$true] %s572_s13 }
  0xa3   : > { %p5171_p5 = scmp.ne.s32.totalorder %s5158_s1, 0 }
  0xa5   : > { %p5172_p10 = pneg %p5171_p5 }
  0xa7   : > { %s4490_s19 = scalar_lea.hbm %s5169_s8, %s4410_s16 }
  0xa8   : > { %s3913_s12 = scalar_lea.hbm %s5170_s9, 16 }
  0xa9   : > { %p3914_p7 = scmp.ne.s32.totalorder %s5170_s9, %s3913_s12  ;;  %p3920_p13 = scmp.lt.u32.totalorder %s3913_s12, %s5170_s9 }
  0xab   : > { %p3916_p1 = pnand %p3914_p7, %p5172_p10 }
  0xad   : > { %p3917_p3 = pneg %p3916_p1 }
  0xaf   : > { %p3922_p2 = pnand %p3920_p13, %p3917_p3 }
  0xb1   : > { %3925 = shalt.err (!%p3922_p2)
}
  0xb2   : > { %s3926_s23 = scalar_lea.vmem %s573_s13, 16  ;;  %p5173_p8 = pmov %p5172_p10 }
  0xb3   : > { %p3927_p4 = scmp.ne.s32.totalorder %s573_s13, %s3926_s23  ;;  %s3933_s17 = scalar_lea.vmem %s573_s13, 32 }
  0xb4   : > { %p3934_p12 = scmp.lt.s32.totalorder %s573_s13, %s573_s13  ;;  %p3935_p6 = scmp.lt.s32.totalorder %s3933_s17, %s3926_s23 }
  0xb5   : > { %p3929_p0 = pnand %p3927_p4, %p5173_p8 }
  0xb6   : > { %p3936_p9 = por %p3935_p6, %p3934_p12 }
  0xb7   : > { %p3930_p11 = pneg %p3929_p0 }
  0xb9   : > { %p3937_p7 = pnand %p3936_p9, %p3930_p11 }
  0xbb   : > { %3940 = shalt.err (!%p3937_p7)
}
  0xbc   : > { %3547 = dma.hbm_to_vmem [thread:$0]  (!%p5171_p5), %s5170_s9, 16, %s573_s13, [#allocation4]  }
  0xbd   : > { %s648_s12 = scalar_lea.vmem [#allocation8], %s4343_s26  ;;  %s3941_s25 = scalar_lea.hbm %s4490_s19, 16 }
  0xbe   : > { %s655_s11 = sshll.u32 %s648_s12, 4  ;;  %p3942_p10 = scmp.ne.s32.totalorder %s4490_s19, %s3941_s25  ;;  %s656_s11 = int_to_ptr.vmem [resolvable:$true] %s655_s11 }
  0xbf   : > { %p5174_p6 = scmp.ne.s32.totalorder %s5163_s0, 0  ;;  %s3946_s6 = scalar_lea.hbm %s5169_s8, 32 }
  0xc0   : > { %p3947_p3 = scmp.lt.u32.totalorder %s4490_s19, %s5169_s8  ;;  %p3948_p13 = scmp.lt.u32.totalorder %s3946_s6, %s3941_s25 }
  0xc1   : > { %p3944_p9 = pnand %p3942_p10, %p5174_p6  ;;  %p3950_p4 = scmp.lt.u32.totalorder %s3941_s25, %s4490_s19 }
  0xc2   : > { %p3949_p2 = por %p3948_p13, %p3947_p3 }
  0xc3   : > { %p3945_p1 = pneg %p3944_p9 }
  0xc4   : > { %p3951_p5 = por %p3950_p4, %p3949_p2 }
  0xc6   : > { %p3952_p8 = pnand %p3951_p5, %p3945_p1 }
  0xc8   : > { %3955 = shalt.err (!%p3952_p8)
}
  0xc9   : > { %s3956_s13 = scalar_lea.vmem %s656_s11, 16  ;;  %s4154_s28 = smov [#allocation8]  }
  0xca   : > { %p3957_p0 = scmp.ne.s32.totalorder %s656_s11, %s3956_s13  ;;  %s3961_s23 = sshll.u32 %s4154_s28, 4  ;;  %s3962_s23 = int_to_ptr.vmem [resolvable:$false] %s3961_s23 }
  0xcb   : > { %s3963_s17 = scalar_lea.vmem %s3962_s23, 32  ;;  %p3964_p7 = scmp.lt.s32.totalorder %s656_s11, %s3962_s23 }
  0xcc   : > { %p3959_p11 = pnand %p3957_p0, %p5174_p6  ;;  %p3965_p10 = scmp.lt.s32.totalorder %s3963_s17, %s3956_s13 }
  0xce   : > { %p3960_p12 = pneg %p3959_p11  ;;  %p3966_p9 = por %p3965_p10, %p3964_p7 }
  0xd0   : > { %p3967_p3 = pnand %p3966_p9, %p3960_p12 }
  0xd2   : > { %3970 = shalt.err (!%p3967_p3)
}
  0xd3   : > { %p5175_p13 = scmp.ne.s32.totalorder %s5159_s3, 0  ;;  %s5176_s7 = scalar_lea.sflag [#allocation7], %s4328_s21 }
  0xd4   : > { %s3971_s4 = scalar_lea.hbm %s4446_s20, 2048  ;;  %s3976_s24 = scalar_lea.hbm %s5096_s10, 4096 }
  0xd5   : > { %3557 = dma.hbm_to_vmem [thread:$0]  (!%p5175_p13), %s4490_s19, 16, %s656_s11, %s5176_s7  }
  0xd6   : > { %p3972_p1 = scmp.ne.s32.totalorder %s4446_s20, %s3971_s4  ;;  %p3977_p5 = scmp.lt.u32.totalorder %s4446_s20, %s5096_s10 }
  0xd7   : > { %p3978_p8 = scmp.lt.u32.totalorder %s3976_s24, %s3971_s4  ;;  %p3980_p11 = scmp.lt.u32.totalorder %s3971_s4, %s4446_s20 }
  0xd8   : > { %p3974_p2 = pnand %p3972_p1, %p5174_p6 }
  0xd9   : > { %p3979_p0 = por %p3978_p8, %p3977_p5 }
  0xda   : > { %p3975_p4 = pneg %p3974_p2 }
  0xdb   : > { %p3981_p12 = por %p3980_p11, %p3979_p0 }
  0xdd   : > { %p3982_p7 = pnand %p3981_p12, %p3975_p4 }
  0xdf   : > { %3985 = shalt.err (!%p3982_p7)
}
  0xe0   : > { %s3986_s19 = scalar_lea.vmem %s4448_s18, 2048  ;;  %s4155_s11 = smov [#allocation11]  }
  0xe1   : > { %p3987_p10 = scmp.ne.s32.totalorder %s4448_s18, %s3986_s19  ;;  %s3991_s27 = sshll.u32 %s4155_s11, 4  ;;  %s3992_s27 = int_to_ptr.vmem [resolvable:$false] %s3991_s27 }
  0xe2   : > { %s3993_s5 = scalar_lea.vmem %s3992_s27, 4096  ;;  %p3994_p1 = scmp.lt.s32.totalorder %s4448_s18, %s3992_s27 }
  0xe3   : > { %p3989_p9 = pnand %p3987_p10, %p5174_p6  ;;  %p3995_p2 = scmp.lt.s32.totalorder %s3993_s5, %s3986_s19 }
  0xe5   : > { %p3990_p3 = pneg %p3989_p9  ;;  %p3996_p5 = por %p3995_p2, %p3994_p1 }
  0xe7   : > { %p3997_p8 = pnand %p3996_p5, %p3990_p3 }
  0xe9   : > { %4000 = shalt.err (!%p3997_p8)
}
  0xea   : > { %s4156_s13 = smov 128   ;;  %s4157_s28 = smov 8  }
  0xeb   : > { %s5177_s23 = scalar_lea.sflag [#allocation10], %s4328_s21  ;;  %s4559_s4 = scalar_lea.hbm %s5100_s14, %s4410_s16 }
  0xec   : > { %3563 = dma.hbm_to_vmem [thread:$0]  (!%p5175_p13), %s4446_s20, 2048, %s4448_s18, %s5177_s23, %s4156_s13, %s4156_s13, %s4157_s28  }
  0xed   : > { %s737_s12 = scalar_lea.vmem [#allocation14], %s4343_s26  ;;  %s4001_s24 = scalar_lea.hbm %s4559_s4, 16 }
  0xee   : > { %s744_s25 = sshll.u32 %s737_s12, 4  ;;  %p4002_p4 = scmp.ne.s32.totalorder %s4559_s4, %s4001_s24  ;;  %s745_s25 = int_to_ptr.vmem [resolvable:$true] %s744_s25 }
  0xef   : > { %s4006_s18 = scalar_lea.hbm %s5100_s14, 32  ;;  %p4007_p12 = scmp.lt.u32.totalorder %s4559_s4, %s5100_s14 }
  0xf0   : > { %p4004_p0 = pnand %p4002_p4, %p5174_p6  ;;  %p4008_p7 = scmp.lt.u32.totalorder %s4006_s18, %s4001_s24 }
  0xf1   : > { %p4010_p9 = scmp.lt.u32.totalorder %s4001_s24, %s4559_s4 }
  0xf2   : > { %p4005_p11 = pneg %p4004_p0  ;;  %p4009_p10 = por %p4008_p7, %p4007_p12 }
  0xf4   : > { %p4011_p3 = por %p4010_p9, %p4009_p10 }
  0xf6   : > { %p4012_p1 = pnand %p4011_p3, %p4005_p11 }
  0xf8   : > { %4015 = shalt.err (!%p4012_p1)
}
  0xf9   : > { %s4016_s11 = scalar_lea.vmem %s745_s25, 16  ;;  %s4158_s27 = smov [#allocation14]  }
  0xfa   : > { %p4017_p2 = scmp.ne.s32.totalorder %s745_s25, %s4016_s11  ;;  %s4021_s5 = sshll.u32 %s4158_s27, 4  ;;  %s4022_s5 = int_to_ptr.vmem [resolvable:$false] %s4021_s5 }
  0xfb   : > { %s4023_s13 = scalar_lea.vmem %s4022_s5, 32  ;;  %p4024_p4 = scmp.lt.s32.totalorder %s745_s25, %s4022_s5 }
  0xfc   : > { %p4019_p5 = pnand %p4017_p2, %p5174_p6  ;;  %p4025_p0 = scmp.lt.s32.totalorder %s4023_s13, %s4016_s11 }
  0xfe   : > { %p4020_p8 = pneg %p4019_p5  ;;  %p4026_p13 = por %p4025_p0, %p4024_p4 }
 0x100   : > { %p4027_p7 = pnand %p4026_p13, %p4020_p8 }
 0x102   : > { %4030 = shalt.err (!%p4027_p7)
}
 0x103   : > { %p5178_p12 = scmp.ne.s32.totalorder %s5159_s3, 0  ;;  %s4585_s17 = scalar_lea.hbm %s5101_s15, %s4410_s16 }
 0x104   : > { %s754_s7 = scalar_lea.vmem [#allocation15], %s4343_s26  ;;  %s752_s24 = scalar_lea.sflag [#allocation16], %s4328_s21 }
 0x105   : > { %3569 = dma.hbm_to_vmem [thread:$0]  (!%p5178_p12), %s4559_s4, 16, %s745_s25, %s708_s30  }
 0x106   : > { %s761_s12 = sshll.u32 %s754_s7, 4  ;;  %s4031_s1 = scalar_lea.hbm %s4585_s17, 16  ;;  %s762_s12 = int_to_ptr.vmem [resolvable:$true] %s761_s12 }
 0x107   : > { %p4032_p13 = scmp.ne.s32.totalorder %s4585_s17, %s4031_s1  ;;  %s4036_s4 = scalar_lea.hbm %s5101_s15, 32 }
 0x108   : > { %p4037_p9 = scmp.lt.u32.totalorder %s4585_s17, %s5101_s15  ;;  %p4038_p3 = scmp.lt.u32.totalorder %s4036_s4, %s4031_s1 }
 0x109   : > { %p4034_p11 = pnand %p4032_p13, %p5174_p6  ;;  %p4040_p2 = scmp.lt.u32.totalorder %s4031_s1, %s4585_s17 }
 0x10a   : > { %p4039_p1 = por %p4038_p3, %p4037_p9 }
 0x10b   : > { %p4035_p10 = pneg %p4034_p11 }
 0x10c   : > { %p4041_p5 = por %p4040_p2, %p4039_p1 }
 0x10e   : > { %p4042_p8 = pnand %p4041_p5, %p4035_p10 }
 0x110   : > { %4045 = shalt.err (!%p4042_p8)
}
 0x111   : > { %s4046_s21 = scalar_lea.vmem %s762_s12, 16  ;;  %s4159_s26 = smov [#allocation15]  }
 0x112   : > { %p4047_p4 = scmp.ne.s32.totalorder %s762_s12, %s4046_s21  ;;  %s4051_s18 = sshll.u32 %s4159_s26, 4  ;;  %s4052_s18 = int_to_ptr.vmem [resolvable:$false] %s4051_s18 }
 0x113   : > { %s4053_s20 = scalar_lea.vmem %s4052_s18, 32  ;;  %p4054_p13 = scmp.lt.s32.totalorder %s762_s12, %s4052_s18 }
 0x114   : > { %p4049_p0 = pnand %p4047_p4, %p5174_p6  ;;  %p4055_p11 = scmp.lt.s32.totalorder %s4053_s20, %s4046_s21 }
 0x116   : > { %p4050_p7 = pneg %p4049_p0  ;;  %p4056_p12 = por %p4055_p11, %p4054_p13 }
 0x118   : > { %p4057_p3 = pnand %p4056_p12, %p4050_p7 }
 0x11a   : > { %4060 = shalt.err (!%p4057_p3)
}
 0x11b   : > { %p5179_p9 = scmp.ne.s32.totalorder %s5159_s3, 0  ;;  %p5180_p10 = scmp.ne.s32.totalorder %s5157_s29, 0 }
 0x11c   : > { %p5181_p1 = scmp.eq.s32.totalorder (!%p5180_p10), %s4291_s2, 0 }
 0x11d   : > { %3572 = dma.hbm_to_vmem [thread:$0]  (!%p5179_p9), %s4585_s17, 16, %s762_s12, %s752_s24  }
 0x11e   : > { %770 = sbr.rel (%p5180_p10) target bundleno = 4331 (0x10eb), region = 100 }
 0x125   : > { %4104 = dma.done.wait (%p5181_p1), [#allocation4], 16   ;;  %p5182_p6 = pmov %p5181_p1 }
 0x126   : > { %s5183_s0 = sld [smem:[#allocation29_spill]]  ;;  %s776_s19 = sand.u32 1, %s4291_s2  }
 0x127   : > { %4106 = vsyncadd (%p5182_p6), [#allocation4], 4294967280  ;;  %s4614_s11 = sand.u32 1, %s4137_s22   ;;  %s777_s3 = scalar_lea.sflag [#allocation7], %s776_s19 }
 0x128   : > { %s3151_s27 = sshll.u32 %s4614_s11, 6 }
 0x129   : > { %s4617_s5 = scalar_lea.vmem [#allocation6], %s3151_s27 }
 0x12c   : > { %p5184_p12 = scmp.ne.s32.totalorder %s5183_s0, 0 }
 0x12e   : > { %4108 = dma.done.wait (%p5184_p12), %s777_s3, 1040  }
 0x12f   : > { %4110 = vsyncadd (%p5184_p12), %s777_s3, 4294966256  ;;  %s794_s13 = scalar_lea.sflag [#allocation10], %s776_s19 }
 0x130   : > { %4112 = dma.done.wait (%p5184_p12), %s794_s13, 2064  }
 0x131   : > { %4114 = vsyncadd (%p5184_p12), %s794_s13, 4294965232  ;;  %s3152_s23 = sshll.u32 %s4614_s11, 7  ;;  %s811_s7 = scalar_lea.sflag [#allocation13], %s776_s19 }
 0x132   : > { %s4630_s17 = scalar_lea.vmem [#allocation11], %s3152_s23  ;;  %s4632_s12 = scalar_lea.vmem [#allocation12], %s3152_s23 }
 0x133   : > { %4116 = dma.done.wait (%p5184_p12), %s811_s7, 2064  }
 0x134   : > { %4118 = vsyncadd (%p5184_p12), %s811_s7, 4294965232  ;;  %s828_s1 = scalar_lea.sflag [#allocation16], %s776_s19 }
 0x135   : > { %4120 = dma.done.wait (%p5184_p12), %s828_s1, 16  }
 0x136   : > { %4122 = vsyncadd (%p5184_p12), %s828_s1, 4294967280  ;;  %p5185_p2 = pmov %p5181_p1 }
 0x137   : > { %p5186_p5 = pmov %p5181_p1 }
 0x138   : > { %4124 = dma.done.wait (%p5185_p2), [#allocation16], 16  }
 0x139   : > { %4126 = vsyncadd (%p5186_p5), [#allocation16], 4294967280  ;;  %p931_p8 = scmp.lt.s32.totalorder %s4291_s2, 1  ;;  %s5187_s21 = sld [smem:[#allocation37_spill]] }
 0x13a   : > { %s5188_s27 = sld [smem:[#allocation34_spill]]  ;;  %s5189_s7 = sld [smem:[#allocation40_spill]] }
 0x13b   : > { %s4650_s30 = scalar_select %p931_p8, %s4291_s2, 1 }
 0x13c   : > { %s5190_s28 = sld [smem:[#allocation35_spill]]  ;;  %s5191_s16 = sld [smem:[#allocation42_spill]] }
 0x13d   : > { %s3516_s4 = smul.u32 192, %s4650_s30  ;;  %s3156_s20 = sshll.u32 %s4650_s30, 1 }
 0x13e   : > { %s3517_s18 = smul.u32 3, %s4650_s30  ;;  %p5192_p4 = scmp.ne.s32.totalorder %s4291_s2, 0 }
 0x13f   : > { %s942_s26 = scalar_lea.vmem %s5187_s21, %s4650_s30  ;;  %s5193_s19 = sld [smem:[#allocation30_spill]] (!%p5192_p4)  ;;  %v3159_v35 = vld [vmem:[#allocation3] ss:$0 sm:$0xff] (!%p5192_p4) }
 0x140   : > { %s4662_s3 = scalar_lea.vmem %s5188_s27, %s3516_s4  ;;  %s4667_s1 = scalar_lea.vmem %s5189_s7, %s3156_s20 }
 0x141   : > { %954 = sbr.rel (%p5192_p4) target bundleno = 646 (0x286), region = 140  ;;  %s5194_s23 = sld [smem:[#allocation32_spill]] (!%p5192_p4) }
 0x142   : > { %s4672_s29 = scalar_lea.vmem %s5190_s28, %s3517_s18  ;;  %s949_s21 = scalar_lea.vmem %s5191_s16, %s4650_s30 }
 0x145   : > { %v955_v0 = vld [vmem:[%s5193_s19] sm:$0xff] (!%p5192_p4)  ;;  %v957_v1 = vld [vmem:[%s5193_s19 + $0x10] sm:$0xff] (!%p5192_p4)  ;;  %v956_v2 = vld [vmem:[%s5193_s19 + $0x8] sm:$0xff] (!%p5192_p4) }
 0x146   : > { %961 = vadd.xlane.f32.xlu0 (!%p5192_p4), %v955_v0  ;;  %965 = vadd.xlane.f32.xlu1 (!%p5192_p4), %v957_v1  ;;  %v958_v3 = vld [vmem:[%s5193_s19 + $0x18] sm:$0xff] (!%p5192_p4) }
 0x147   : > { %v3158_v33 = vld [vmem:[%s5194_s23] ss:$0 sm:$0xff] (!%p5192_p4) }
 0x14a   : > { %963 = vadd.xlane.f32.xlu0 %v956_v2  ;;  %967 = vadd.xlane.f32.xlu1 %v958_v3 }
 0x1d3   : > { %v962_v4 = vpop.xlane.xlu0 %961  ;;  %v966_v5 = vpop.xlane.xlu1 %965 }
 0x1d4   : > { %v970_v6 = vmul.f32 0.0078125, %v962_v4  ;;  %v972_v7 = vmul.f32 0.0078125, %v966_v5 }
 0x1d6   : > { %v974_v8 = vsub.f32 %v955_v0, %v970_v6  ;;  %v976_v9 = vsub.f32 %v957_v1, %v972_v7 }
 0x1d7   : > { %v964_v10 = vpop.xlane.xlu0 %963  ;;  %v968_v11 = vpop.xlane.xlu1 %967 }
 0x1d8   : > { %v971_v12 = vmul.f32 0.0078125, %v964_v10  ;;  %v978_v13 = vmul.f32 %v974_v8, %v974_v8  ;;  %v973_v14 = vmul.f32 0.0078125, %v968_v11  ;;  %v980_v17 = vmul.f32 %v976_v9, %v976_v9 }
 0x1da   : > { %v975_v15 = vsub.f32 %v956_v2, %v971_v12  ;;  %982 = vadd.xlane.f32.xlu0 %v978_v13  ;;  %v977_v16 = vsub.f32 %v958_v3, %v973_v14 }
 0x1dc   : > { %v979_v18 = vmul.f32 %v975_v15, %v975_v15  ;;  %v981_v19 = vmul.f32 %v977_v16, %v977_v16 }
 0x1de   : > { %986 = vadd.xlane.f32.xlu0 %v980_v17  ;;  %984 = vadd.xlane.f32.xlu1 %v979_v18 }
 0x1e2   : > { %988 = vadd.xlane.f32.xlu1 %v981_v19 }
 0x267   : > { %v983_v20 = vpop.xlane.xlu0 %982 }
 0x268   : > { %v990_v21 = vmul.f32 0.0078125, %v983_v20 }
 0x26a   : > { %v994_v22 = vadd.f32 1e-12, %v990_v21 }
 0x26b   : > { %v985_v23 = vpop.xlane.xlu1 %984  ;;  %v987_v24 = vpop.xlane.xlu0 %986 }
 0x26c   : > { %3625 = vrsqrt.f32 %v994_v22  ;;  %v991_v25 = vmul.f32 0.0078125, %v985_v23  ;;  %v992_v26 = vmul.f32 0.0078125, %v987_v24 }
 0x26e   : > { %v995_v27 = vadd.f32 1e-12, %v991_v25  ;;  %v996_v28 = vadd.f32 1e-12, %v992_v26 }
 0x26f   : > { %v989_v29 = vpop.xlane.xlu1 %988 }
 0x270   : > { %3627 = vrsqrt.f32 %v995_v27  ;;  %v993_v30 = vmul.f32 0.0078125, %v989_v29 }
 0x271   : > { %3629 = vrsqrt.f32 %v996_v28 }
 0x272   : > { %v997_v31 = vadd.f32 1e-12, %v993_v30 }
 0x274   : > { %3631 = vrsqrt.f32 %v997_v31 }
 0x276   : > { %v3626_v32 = vpop.eup %3625 }
 0x277   : > { %v1002_v34 = vmul.f32 %v3626_v32, %v974_v8 }
 0x279   : > { %v1012_v36 = vmul.f32 %v3158_v33, %v1002_v34 }
 0x27a   : > { %v3628_v37 = vpop.eup %3627 }
 0x27b   : > { %v3630_v38 = vpop.eup %3629  ;;  %v1022_v39 = vadd.f32 %v3159_v35, %v1012_v36  ;;  %v1003_v40 = vmul.f32 %v3628_v37, %v975_v15 }
 0x27c   : > { %v1004_v41 = vmul.f32 %v3630_v38, %v976_v9 }
 0x27d   : > { %1026 = vst [vmem:[#allocation2] sm:$0xff] %v1022_v39  ;;  %v1013_v42 = vmul.f32 %v3158_v33, %v1003_v40 }
 0x27e   : > { %v3632_v43 = vpop.eup %3631  ;;  %v1014_v44 = vmul.f32 %v3158_v33, %v1004_v41 }
 0x27f   : > { %v1023_v45 = vadd.f32 %v3159_v35, %v1013_v42  ;;  %v1005_v46 = vmul.f32 %v3632_v43, %v977_v16 }
 0x280   : > { %v1024_v47 = vadd.f32 %v3159_v35, %v1014_v44 }
 0x281   : > { %1027 = vst [vmem:[#allocation2 + $0x8] sm:$0xff] %v1023_v45  ;;  %v1015_v48 = vmul.f32 %v3158_v33, %v1005_v46 }
 0x282   : > { %1028 = vst [vmem:[#allocation2 + $0x10] sm:$0xff] %v1024_v47 }
 0x283   : > { %v1025_v49 = vadd.f32 %v3159_v35, %v1015_v48 }
 0x285   : > { %1029 = vst [vmem:[#allocation2 + $0x18] sm:$0xff] %v1025_v49 }
 0x286 PF: > { %v3633_v50 = vld [vmem:[%s4662_s3 + $0x4] ss:$12 sps:$4 sm:$0xff]   ;;  %v3635_v51 = vld [vmem:[%s4662_s3] ss:$12 sps:$4 sm:$0xff]   ;;  %v4160_v52 = vmov 0   ;;  %v4161_v17 = vmov 0.0   ;;  %v1070_v18 = vlaneseq }
 0x287   : > { %1245 = vmatprep.mubr.bf16.mxu0 %v4160_v52  ;;  %1213 = vmatprep.subr.bf16.mxu0 %v3633_v50  ;;  %v3636_v53 = vld [vmem:[%s4662_s3 + $0x1c] ss:$12 sps:$4 sm:$0xff]   ;;  %v3638_v54 = vld [vmem:[%s4662_s3 + $0x18] ss:$12 sps:$4 sm:$0xff]   ;;  %v3639_v55 = vld [vmem:[%s4662_s3 + $0x34] ss:$12 sps:$4 sm:$0xff]  }
 0x288   : > { %1214 = vmatpush1.bf16.msra.mxu0 %v3635_v51  ;;  %v3641_v56 = vld [vmem:[%s4662_s3 + $0x30] ss:$12 sps:$4 sm:$0xff]   ;;  %v3642_v57 = vld [vmem:[%s4662_s3 + $0x4c] ss:$12 sps:$4 sm:$0xff]   ;;  %v3644_v58 = vld [vmem:[%s4662_s3 + $0x48] ss:$12 sps:$4 sm:$0xff]  }
 0x289   : > { %1215 = vmatprep.subr.bf16.mxu0 %v3636_v53  ;;  %v3645_v59 = vld [vmem:[%s4662_s3 + $0x64] ss:$12 sps:$4 sm:$0xff]   ;;  %v4707_v61 = vld [vmem:[#allocation2 + $0x8] sm:$0xff]  ;;  %v3651_v5 = vld [vmem:[%s4662_s3 + $0x94] ss:$12 sps:$4 sm:$0xff]   ;;  %vm4162_vm0 = vmmov 0  }
 0x28a   : > { %v4705_v60 = vld [vmem:[#allocation2] sm:$0xff]  ;;  %v3657_v63 = vld [vmem:[%s4662_s3 + $0x8] ss:$12 sps:$4 sm:$0xff]   ;;  %v3660_v6 = vld [vmem:[%s4662_s3 + $0x50] ss:$12 sps:$4 sm:$0xff]   ;;  %v1071_v19 = vshrl.u32 %v1070_v18, 7 }
 0x28b   : > { %v1034_v62 = vpack.c.bf16 %v4707_v61, %v4705_v60  ;;  %v3658_v0 = vld [vmem:[%s4662_s3 + $0x20] ss:$12 sps:$4 sm:$0xff]   ;;  %3360 = vmatprep.subr.bf16.mxu1 %v3657_v63  ;;  %v3648_v2 = vld [vmem:[%s4662_s3 + $0x7c] ss:$12 sps:$4 sm:$0xff]   ;;  %v3659_v3 = vld [vmem:[%s4662_s3 + $0x38] ss:$12 sps:$4 sm:$0xff]  }
 0x28c   : > { %1216 = vmatpush1.bf16.msra.mxu0 %v3638_v54  ;;  %v3647_v1 = vld [vmem:[%s4662_s3 + $0x60] ss:$12 sps:$4 sm:$0xff]   ;;  %3361 = vmatpush3.bf16.msra.mxu1 %v3657_v63  ;;  %v3650_v4 = vld [vmem:[%s4662_s3 + $0x78] ss:$12 sps:$4 sm:$0xff]   ;;  %v3653_v7 = vld [vmem:[%s4662_s3 + $0x90] ss:$12 sps:$4 sm:$0xff]  }
 0x28d   : > { %1217 = vmatprep.subr.bf16.mxu0 %v3639_v55  ;;  %3376 = vmatprep.mubr.bf16.mxu1 %v1034_v62  ;;  %v3654_v8 = vld [vmem:[%s4662_s3 + $0xac] ss:$12 sps:$4 sm:$0xff]   ;;  %v3661_v9 = vld [vmem:[%s4662_s3 + $0x68] ss:$12 sps:$4 sm:$0xff]   ;;  %v3664_v13 = vld [vmem:[%s4662_s3 + $0xb0] ss:$12 sps:$4 sm:$0xff]  }
 0x28e   : > { %3362 = vmatprep.subr.bf16.mxu1 %v3658_v0  ;;  %v3656_v10 = vld [vmem:[%s4662_s3 + $0xa8] ss:$12 sps:$4 sm:$0xff]   ;;  %v3662_v11 = vld [vmem:[%s4662_s3 + $0x80] ss:$12 sps:$4 sm:$0xff]   ;;  %v3663_v12 = vld [vmem:[%s4662_s3 + $0x98] ss:$12 sps:$4 sm:$0xff]  }
 0x28f   : > { %v4727_v14 = vld [vmem:[#allocation2 + $0x10] sm:$0xff]  ;;  %v4729_v15 = vld [vmem:[#allocation2 + $0x18] sm:$0xff]  ;;  %v4739_v20 = vsub.s32 0, %v1071_v19  ;;  %v1068_v21 = vld [vmem:[%s4672_s29] sm:$0x7]  ;;  %v4742_v22 = vsub.s32 1, %v1071_v19 }
 0x290   : > { %1218 = vmatpush1.bf16.msra.mxu0 %v3641_v56  ;;  %3363 = vmatpush3.bf16.msra.mxu1 %v3658_v0  ;;  %v1035_v16 = vpack.c.bf16 %v4729_v15, %v4727_v14  ;;  %vm1338_vm1 = vcmask 523264   ;;  %s4163_s29 = smov 64   ;;  %v1080_v36 = vsub.s32 2, %v1071_v19  ;;  %s5195_s25 = sld [smem:[#allocation31_spill]]  ;;  %vm1390_vm2 = vcmask 130048  }
 0x291   : > { %1219 = vmatprep.subr.bf16.mxu0 %v3642_v57  ;;  %3364 = vmatprep.subr.bf16.mxu1 %v3659_v3  ;;  %v4745_v23 = vrot.slane %v1068_v21, %v4739_v20  ;;  %v4748_v25 = vrot.slane %v1068_v21, %v4742_v22  ;;  %s5200_s30 = scalar_lea.vmem [#allocation14], %s4614_s11  ;;  %p3242_p0 = scmp.ne.s32.totalorder %s4291_s2, 1 }
 0x292   : > { %v1081_v37 = vrot.slane %v1068_v21, %v1080_v36  ;;  %s5202_s13 = sld [smem:[#allocation43_spill]] (!%p3242_p0)  ;;  %vm4165_vm3 = vmmov (!%p3242_p0), 0   ;;  %s5203_s23 = sld [smem:[#allocation45_spill]] (!%p3242_p0)  ;;  %vm2654_vm4 = vcmask (!%p3242_p0), 1040384  }
 0x293   : > { %s5205_s16 = sld [smem:[#allocation46_spill]] (!%p3242_p0) }
 0x294   : > { %1220 = vmatpush1.bf16.msra.mxu0 %v3644_v58  ;;  %3365 = vmatpush3.bf16.msra.mxu1 %v3659_v3 }
 0x295   : > { %1221 = vmatprep.subr.bf16.mxu0 %v3645_v59  ;;  %3366 = vmatprep.subr.bf16.mxu1 %v3660_v6 }
 0x296   : > { %v4775_v51 = vld [vmem:[%s5195_s25] sm:$0x3] }
 0x297   : > { %v1335_v53 = vrot.slane %v4775_v51, %v4739_v20 }
 0x298   : > { %1222 = vmatpush1.bf16.msra.mxu0 %v3647_v1  ;;  %3367 = vmatpush3.bf16.msra.mxu1 %v3660_v6 }
 0x299   : > { %1223 = vmatprep.subr.bf16.mxu0 %v3648_v2  ;;  %3368 = vmatprep.subr.bf16.mxu1 %v3661_v9 }
 0x29c   : > { %1224 = vmatpush1.bf16.msra.mxu0 %v3650_v4  ;;  %3369 = vmatpush3.bf16.msra.mxu1 %v3661_v9 }
 0x29d   : > { %1225 = vmatprep.subr.bf16.mxu0 %v3651_v5  ;;  %3370 = vmatprep.subr.bf16.mxu1 %v3662_v11 }
 0x2a0   : > { %1226 = vmatpush1.bf16.msra.mxu0 %v3653_v7  ;;  %3371 = vmatpush3.bf16.msra.mxu1 %v3662_v11 }
 0x2a1   : > { %1227 = vmatprep.subr.bf16.mxu0 %v3654_v8  ;;  %3372 = vmatprep.subr.bf16.mxu1 %v3663_v12 }
 0x2a4   : > { %1228 = vmatpush1.bf16.msra.mxu0 %v3656_v10  ;;  %3373 = vmatpush3.bf16.msra.mxu1 %v3663_v12 }
 0x2a5   : > { %3374 = vmatprep.subr.bf16.mxu1 %v3664_v13  ;;  %3386 = vmatprep.subr.bf16.mxu0 %v4161_v17 }
 0x2a7   : > { %1246 = vmatmul.mubr.bf16.vlgmr.msra.gmra.mrb[0].mxu0 %v1034_v62 }
 0x2a8   : > { %1255 = vmatprep.mubr.bf16.mxu0 %v4160_v52  ;;  %3375 = vmatpush3.bf16.msra.mxu1 %v3664_v13 }
 0x2a9   : > { %3380 = vmatprep.subr.bf16.mxu1 %v4161_v17 }
 0x2ab   : > { %3377 = vmatmul.mubr.bf16.vlgmr.msra.gmra.mrb[0].mxu1 %v1035_v16 }
 0x2ac   : > { %3382 = vmatprep.mubr.msk.bf16.mxu1 %vm4162_vm0, %v4161_v17 }
 0x2af   : > { %1256 = vmatmul.mubr.bf16.gmra.mrb[4].mxu0 %v1035_v16 }
 0x2b0   : > { %3388 = vmatprep.mubr.msk.bf16.mxu0 %vm4162_vm0, %v4161_v17 }
 0x37a   : > { %v1247_v24 = vpop.f32.mrb[0].mxu0 }
 0x37b   : > { %v1249_v26 = vpop.f32.mrb[1].mxu0  ;;  %v1248_v28 = vadd.f32 %v1247_v24, %v4745_v23 }
 0x37c   : > { %v1251_v27 = vpop.f32.mrb[2].mxu0  ;;  %v1250_v31 = vadd.f32 %v1249_v26, %v4748_v25 }
 0x37d   : > { %v1252_v29 = vadd.f32 %v1251_v27, %v4745_v23  ;;  %v1253_v30 = vpop.f32.mrb[3].mxu0 }
 0x37e   : > { %v1254_v32 = vadd.f32 %v1253_v30, %v4748_v25  ;;  %v3378_v38 = vpop.f32.mrb[0].mxu1 }
 0x37f   : > { %v1336_v33 = vpack.c.bf16 %v1252_v29, %v1248_v28  ;;  %v1309_v39 = vadd.f32 %v3378_v38, %v1081_v37  ;;  %v1300_v40 = vpop.f32.mrb[1].mxu1 }
 0x380   : > { %v1337_v34 = vpack.c.bf16 %v1254_v32, %v1250_v31  ;;  %v1301_v41 = vadd.f32 %v1300_v40, %v1081_v37  ;;  %v3379_v42 = vpop.f32.mrb[2].mxu1 }
 0x381   : > { %v1312_v43 = vadd.f32 %v3379_v42, %v1081_v37  ;;  %v1303_v44 = vpop.f32.mrb[3].mxu1 }
 0x382   : > { %1464 = vrot.lane.b32.xlu0 %v1337_v34, %s4163_s29  ;;  %v1343_v35 = vsel %vm1338_vm1, %v1337_v34, 0  ;;  %v1304_v45 = vadd.f32 %v1303_v44, %v1081_v37 }
 0x383   : > { %3381 = vmatpush3.bf16.xpose.msra.mxu1 %v1343_v35  ;;  %v4761_v46 = vpack.c.bf16 %v1312_v43, %v1309_v39 }
 0x384   : > { %3392 = vmatprep.subr.bf16.mxu1 %v4161_v17  ;;  %v4763_v47 = vpack.c.bf16 %v1304_v45, %v1301_v41  ;;  %v1257_v41 = vpop.f32.mrb[4].mxu0 }
 0x385   : > { %v1259_v43 = vpop.f32.mrb[5].mxu0  ;;  %v1258_v45 = vadd.f32 %v1257_v41, %v4745_v23 }
 0x386   : > { %1461 = vrot.lane.b32.xlu0 %v1336_v33, %s4163_s29  ;;  %3387 = vmatpush3.bf16.msra.mxu0 %v4763_v47 }
 0x387   : > { %3398 = vmatprep.subr.bf16.mxu0 %v4161_v17 }
 0x38a   : > { %3383 = vmatmul.mubr.msk.bf16.vlgmr.msra.gmra.mrb[4].mxu1 %vm1338_vm1, %v1336_v33 }
 0x38b   : > { %3394 = vmatprep.mubr.msk.bf16.mxu1 %vm4162_vm0, %v4161_v17 }
 0x3f4   : > { %v1465_v48 = vpop.permute.xlu0 %1464 }
 0x3f5   : > { %v1470_v49 = vsel %vm1338_vm1, %v1465_v48, 0 }
 0x3f6   : > { %3393 = vmatpush3.bf16.xpose.msra.mxu1 %v1470_v49 }
 0x3f7   : > { %3404 = vmatprep.subr.bf16.mxu1 %v4161_v17 }
 0x3f8   : > { %v1462_v50 = vpop.permute.xlu0 %1461 }
 0x3fd   : > { %3395 = vmatmul.mubr.msk.bf16.vlgmr.msra.gmra.mrb[8].mxu1 %vm1338_vm1, %v1462_v50  ;;  %v1260_v50 = vadd.f32 %v1259_v43, %v4748_v25 }
 0x3fe   : > { %3412 = vmatprep.mubr.msk.bf16.mxu1 %vm4162_vm0, %v4161_v17 }
 0x45d   : > { %v1379_v54 = vpop.f32.mrb[4].mxu1 }
 0x45e   : > { %v1386_v55 = vmul.f32 0.125, %v1379_v54  ;;  %v3384_v56 = vpop.f32.mrb[5].mxu1 }
 0x45f   : > { %v1382_v57 = vpop.f32.mrb[6].mxu1 }
 0x460   : > { %v1387_v58 = vmul.f32 0.125, %v1382_v57  ;;  %v3385_v59 = vpop.f32.mrb[7].mxu1  ;;  %v1388_v62 = vadd.f32 %v1386_v55, %v1335_v53 }
 0x461   : > { %v4806_v59 = vld [vmem:[%s4617_s5 + $0x28] sm:$0xff]  }
 0x462   : > { %v1391_v63 = vsel %vm1390_vm2, %v1388_v62, -inf  ;;  %v1389_v0 = vadd.f32 %v1387_v58, %v1335_v53 }
 0x463   : > { %1392 = vmax.xlane.f32.xlu1 %v1391_v63 }
 0x464   : > { %v1394_v1 = vsel %vm1390_vm2, %v1389_v0, -inf }
 0x467   : > { %1395 = vmax.xlane.f32.xlu1 %v1394_v1 }
 0x4d0   : > { %v1506_v2 = vpop.f32.mrb[8].mxu1 }
 0x4d1   : > { %v1513_v3 = vmul.f32 0.125, %v1506_v2  ;;  %v3396_v4 = vpop.f32.mrb[9].mxu1 }
 0x4d2   : > { %v1509_v5 = vpop.f32.mrb[10].mxu1 }
 0x4d3   : > { %v1514_v6 = vmul.f32 0.125, %v1509_v5  ;;  %v3397_v7 = vpop.f32.mrb[11].mxu1  ;;  %v1515_v8 = vadd.f32 %v1513_v3, %v1335_v53 }
 0x4d5   : > { %v1517_v9 = vsel %vm1390_vm2, %v1515_v8, -inf  ;;  %v1516_v10 = vadd.f32 %v1514_v6, %v1335_v53  ;;  %v1261_v53 = vpop.f32.mrb[6].mxu0  ;;  %v4820_v6 = vld [vmem:[%s4617_s5] sm:$0xff]  }
 0x4d6   : > { %1518 = vmax.xlane.f32.xlu0 %v1517_v9  ;;  %v1262_v54 = vadd.f32 %v1261_v53, %v4745_v23  ;;  %v4802_v23 = vld [vmem:[%s4617_s5 + $0x20] sm:$0xff]   ;;  %v4832_v9 = vld [vmem:[%s4617_s5 + $0x10] sm:$0xff]  }
 0x4d7   : > { %v1520_v11 = vsel %vm1390_vm2, %v1516_v10, -inf  ;;  %3405 = vmatpush3.bf16.msra.mxu1 %v4802_v23 }
 0x4d8   : > { %1521 = vmax.xlane.f32.xlu1 %v1520_v11  ;;  %v4793_v57 = vpack.c.bf16 %v1262_v54, %v1258_v45  ;;  %3406 = vmatprep.subr.bf16.mxu1 %v4161_v17 }
 0x4db   : > { %3407 = vmatpush3.bf16.msra.mxu1 %v4806_v59 }
 0x4dc   : > { %3408 = vmatprep.subr.bf16.mxu1 %v4161_v17 }
 0x4f0   : > { %v1393_v12 = vpop.xlane.xlu1 %1392 }
 0x4f1   : > { %v1397_v13 = vsub.f32 %v1388_v62, %v1393_v12  ;;  %v4811_v62 = vld [vmem:[%s4617_s5 + $0x30] sm:$0xff]  }
 0x4f2   : > { %3409 = vmatpush3.bf16.msra.mxu1 %v4811_v62 }
 0x4f3   : > { %v1399_v16 = vmul.f32 1.442695, %v1397_v13  ;;  %3410 = vmatprep.subr.bf16.mxu1 %v4161_v17 }
 0x4f4   : > { %v1396_v18 = vpop.xlane.xlu1 %1395 }
 0x4f5   : > { %3713 = vpow2.f32 %v1399_v16  ;;  %v1398_v19 = vsub.f32 %v1389_v0, %v1396_v18  ;;  %v3672_v0 = vld [vmem:[%s4617_s5 + $0x38] sm:$0xff]  }
 0x4f6   : > { %3411 = vmatpush3.bf16.msra.mxu1 %v3672_v0 }
 0x4f7   : > { %v1401_v21 = vmul.f32 1.442695, %v1398_v19  ;;  %3428 = vmatprep.subr.bf16.mxu1 %v4161_v17 }
 0x4f9   : > { %3715 = vpow2.f32 %v1401_v21 }
 0x4ff   : > { %v3714_v24 = vpop.eup %3713 }
 0x500   : > { %v1403_v26 = vsel %vm1390_vm2, %v3714_v24, 0.0 }
 0x501   : > { %1404 = vadd.xlane.f32.xlu1 %v1403_v26 }
 0x503   : > { %v3716_v27 = vpop.eup %3715 }
 0x504   : > { %v1406_v28 = vsel %vm1390_vm2, %v3716_v27, 0.0 }
 0x505   : > { %1407 = vadd.xlane.f32.xlu1 %v1406_v28 }
 0x563   : > { %v1519_v29 = vpop.xlane.xlu0 %1518 }
 0x564   : > { %v1523_v30 = vsub.f32 %v1515_v8, %v1519_v29  ;;  %v4825_v8 = vld [vmem:[%s4617_s5 + $0x8] sm:$0xff]  }
 0x565   : > { %v1522_v31 = vpop.xlane.xlu1 %1521 }
 0x566   : > { %v1525_v32 = vmul.f32 1.442695, %v1523_v30  ;;  %v1524_v33 = vsub.f32 %v1516_v10, %v1522_v31  ;;  %v4837_v10 = vld [vmem:[%s4617_s5 + $0x18] sm:$0xff]  }
 0x568   : > { %3717 = vpow2.f32 %v1525_v32  ;;  %v1527_v34 = vmul.f32 1.442695, %v1524_v33 }
 0x56a   : > { %3719 = vpow2.f32 %v1527_v34 }
 0x572   : > { %v3718_v35 = vpop.eup %3717 }
 0x573   : > { %v1529_v36 = vsel %vm1390_vm2, %v3718_v35, 0.0 }
 0x574   : > { %v3720_v37 = vpop.eup %3719  ;;  %1530 = vadd.xlane.f32.xlu1 %v1529_v36 }
 0x575   : > { %v1532_v38 = vsel %vm1390_vm2, %v3720_v37, 0.0 }
 0x578   : > { %1533 = vadd.xlane.f32.xlu1 %v1532_v38 }
 0x589   : > { %1541 = vrot.lane.b32.xlu1 %v4763_v47, %s4163_s29  ;;  %v1263_v47 = vpop.f32.mrb[7].mxu0 }
 0x58a   : > { %v1264_v56 = vadd.f32 %v1263_v47, %v4748_v25 }
 0x58c   : > { %v1730_v58 = vpack.c.bf16 %v1264_v56, %v1260_v50 }
 0x58d   : > { %1852 = vrot.lane.b32.xlu1 %v4793_v57, %s4163_s29 }
 0x58e   : > { %v1405_v39 = vpop.xlane.xlu1 %1404  ;;  %1855 = vrot.lane.b32.xlu0 %v1730_v58, %s4163_s29  ;;  %v1735_v28 = vsel %vm1338_vm1, %v1730_v58, 0 }
 0x58f   : > { %3721 = vrcp.f32 %v1405_v39 }
 0x592   : > { %v1408_v40 = vpop.xlane.xlu1 %1407 }
 0x593   : > { %3723 = vrcp.f32 %v1408_v40 }
 0x599   : > { %v3722_v42 = vpop.eup %3721 }
 0x59a   : > { %v1411_v48 = vmul.f32 %v3722_v42, %v3714_v24  ;;  %v1728_v42 = vrot.slane %v4775_v51, %v4742_v22 }
 0x59d   : > { %v3724_v44 = vpop.eup %3723 }
 0x59e   : > { %v1412_v49 = vmul.f32 %v3724_v44, %v3716_v27 }
 0x5a0   : > { %v1413_v55 = vpack.c.bf16 %v1412_v49, %v1411_v48 }
 0x5a2   : > { %3389 = vmatmul.mubr.msk.bf16.vlgmr.msra.gmra.mrb[8].mxu0 %vm1390_vm2, %v1413_v55 }
 0x5a3   : > { %3400 = vmatprep.mubr.msk.bf16.mxu0 %vm4162_vm0, %v4161_v17 }
 0x600   : > { %v1856_v29 = vpop.permute.xlu0 %1855 }
 0x601   : > { %v1531_v25 = vpop.xlane.xlu1 %1530  ;;  %v1861_v30 = vsel %vm1338_vm1, %v1856_v29, 0  ;;  %v4880_v29 = vld [vmem:[%s942_s26] ss:$0 sm:$0xff]  ;;  %s5198_s26 = scalar_lea.vmem [#allocation9], %s4614_s11 }
 0x602   : > { %3725 = vrcp.f32 %v1531_v25 }
 0x605   : > { %v1534_v63 = vpop.xlane.xlu1 %1533 }
 0x606   : > { %3727 = vrcp.f32 %v1534_v63 }
 0x609   : > { %v1542_v1 = vpop.permute.xlu1 %1541 }
 0x60a   : > { %3399 = vmatpush3.bf16.msra.mxu0 %v1542_v1 }
 0x60b   : > { %3416 = vmatprep.subr.bf16.mxu0 %v4161_v17 }
 0x60c   : > { %v3726_v2 = vpop.eup %3725 }
 0x60d   : > { %v1537_v4 = vmul.f32 %v3726_v2, %v3718_v35  ;;  %v1853_v31 = vpop.permute.xlu1 %1852 }
 0x610   : > { %v3728_v3 = vpop.eup %3727 }
 0x611   : > { %v1538_v5 = vmul.f32 %v3728_v3, %v3720_v37 }
 0x613   : > { %v1539_v7 = vpack.c.bf16 %v1538_v5, %v1537_v4 }
 0x615   : > { %3401 = vmatmul.mubr.msk.bf16.vlgmr.msra.gmra.mrb[12].mxu0 %vm1390_vm2, %v1539_v7 }
 0x616   : > { %3417 = vmatpush3.bf16.msra.mxu0 %v4820_v6  ;;  %3424 = vmatprep.mubr.msk.bf16.mxu0 %vm4162_vm0, %v4161_v17 }
 0x617   : > { %3418 = vmatprep.subr.bf16.mxu0 %v4161_v17 }
 0x61a   : > { %3419 = vmatpush3.bf16.msra.mxu0 %v4825_v8 }
 0x61b   : > { %3420 = vmatprep.subr.bf16.mxu0 %v4161_v17 }
 0x61e   : > { %3421 = vmatpush3.bf16.msra.mxu0 %v4832_v9 }
 0x61f   : > { %3422 = vmatprep.subr.bf16.mxu0 %v4161_v17 }
 0x622   : > { %3423 = vmatpush3.bf16.msra.mxu0 %v4837_v10 }
 0x623   : > { %3434 = vmatprep.subr.bf16.mxu0 %v4161_v17 }
 0x675   : > { %v1452_v11 = vpop.f32.mrb[8].mxu0 }
 0x676   : > { %v3390_v12 = vpop.f32.mrb[9].mxu0 }
 0x677   : > { %v1455_v13 = vpop.f32.mrb[10].mxu0 }
 0x678   : > { %v1459_v16 = vpack.c.bf16 %v1455_v13, %v1452_v11  ;;  %v3391_v18 = vpop.f32.mrb[11].mxu0 }
 0x67a   : > { %3425 = vmatmul.mubr.msk.bf16.vlgmr.msra.gmra.mrb[16].mxu0 %vm1338_vm1, %v1459_v16 }
 0x67b   : > { %3435 = vmatpush3.bf16.msra.mxu0 %v4761_v46  ;;  %3436 = vmatprep.mubr.msk.bf16.mxu0 %vm4162_vm0, %v4161_v17 }
 0x67c   : > { %3446 = vmatprep.subr.bf16.mxu0 %v4161_v17 }
 0x6e8   : > { %v1581_v19 = vpop.f32.mrb[12].mxu0 }
 0x6e9   : > { %v3402_v21 = vpop.f32.mrb[13].mxu0 }
 0x6ea   : > { %v1584_v24 = vpop.f32.mrb[14].mxu0 }
 0x6eb   : > { %v1588_v26 = vpack.c.bf16 %v1584_v24, %v1581_v19  ;;  %v3403_v27 = vpop.f32.mrb[15].mxu0 }
 0x6ed   : > { %3413 = vmatmul.mubr.msk.bf16.vlgmr.msra.gmra.mrb[12].mxu1 %vm1338_vm1, %v1588_v26 }
 0x6ee   : > { %3429 = vmatpush3.bf16.xpose.msra.mxu1 %v1735_v28  ;;  %3430 = vmatprep.mubr.msk.bf16.mxu1 %vm4162_vm0, %v4161_v17 }
 0x6ef   : > { %3440 = vmatprep.subr.bf16.mxu1 %v4161_v17 }
 0x6f5   : > { %3431 = vmatmul.mubr.msk.bf16.vlgmr.msra.gmra.mrb[16].mxu1 %vm1338_vm1, %v4793_v57 }
 0x6f6   : > { %3441 = vmatpush3.bf16.xpose.msra.mxu1 %v1861_v30  ;;  %3442 = vmatprep.mubr.msk.bf16.mxu1 %vm4162_vm0, %v4161_v17 }
 0x6f7   : > { %3452 = vmatprep.subr.bf16.mxu1 %v4161_v17 }
 0x6fd   : > { %3443 = vmatmul.mubr.msk.bf16.vlgmr.msra.gmra.mrb[20].mxu1 %vm1338_vm1, %v1853_v31 }
 0x6fe   : > { %3453 = vmatpush3.bf16.msra.mxu1 %v4802_v23  ;;  %3460 = vmatprep.mubr.msk.bf16.mxu1 %vm4162_vm0, %v4161_v17 }
 0x6ff   : > { %3454 = vmatprep.subr.bf16.mxu1 %v4161_v17 }
 0x702   : > { %3455 = vmatpush3.bf16.msra.mxu1 %v4806_v59 }
 0x703   : > { %3456 = vmatprep.subr.bf16.mxu1 %v4161_v17 }
 0x706   : > { %3457 = vmatpush3.bf16.msra.mxu1 %v4811_v62 }
 0x707   : > { %3458 = vmatprep.subr.bf16.mxu1 %v4161_v17 }
 0x70a   : > { %3459 = vmatpush3.bf16.msra.mxu1 %v3672_v0 }
 0x74d   : > { %v1718_v32 = vpop.f32.mrb[16].mxu0 }
 0x74e   : > { %v3426_v33 = vpop.f32.mrb[17].mxu0 }
 0x74f   : > { %v1721_v34 = vpop.f32.mrb[18].mxu0 }
 0x750   : > { %v3427_v35 = vpop.f32.mrb[19].mxu0 }
 0x7c0   : > { %v1650_v36 = vpop.f32.mrb[12].mxu1 }
 0x7c1   : > { %v1719_v37 = vadd.f32 %v1718_v32, %v1650_v36  ;;  %v3414_v38 = vpop.f32.mrb[13].mxu1 }
 0x7c2   : > { %v1653_v39 = vpop.f32.mrb[14].mxu1 }
 0x7c3   : > { %v1722_v40 = vadd.f32 %v1721_v34, %v1653_v39  ;;  %v3415_v41 = vpop.f32.mrb[15].mxu1  ;;  %v2075_v32 = vadd.f32 %v4880_v29, %v1719_v37 }
 0x7c5   : > { %v2076_v34 = vadd.f32 %v4880_v29, %v1722_v40  ;;  %v4887_v35 = vadd.f32 %v2075_v32, %v4705_v60  ;;  %v3685_v32 = vld [vmem:[%s4630_s17 + $0x40] ss:$8 sps:$4 sm:$0xff]  }
 0x7c7   : > { %v4891_v36 = vadd.f32 %v2076_v34, %v4707_v61  ;;  %v3688_v34 = vld [vmem:[%s4630_s17 + $0x50] ss:$8 sps:$4 sm:$0xff]  }
 0x7c8   : > { %v1771_v43 = vpop.f32.mrb[16].mxu1 }
 0x7c9   : > { %v1778_v44 = vmul.f32 0.125, %v1771_v43  ;;  %v3432_v45 = vpop.f32.mrb[17].mxu1 }
 0x7ca   : > { %v1774_v48 = vpop.f32.mrb[18].mxu1 }
 0x7cb   : > { %v1779_v49 = vmul.f32 0.125, %v1774_v48  ;;  %v3433_v50 = vpop.f32.mrb[19].mxu1  ;;  %v1780_v53 = vadd.f32 %v1778_v44, %v1728_v42 }
 0x7cd   : > { %v1782_v54 = vsel %vm1390_vm2, %v1780_v53, -inf  ;;  %v1781_v47 = vadd.f32 %v1779_v49, %v1728_v42 }
 0x7ce   : > { %1783 = vmax.xlane.f32.xlu1 %v1782_v54 }
 0x7cf   : > { %v1785_v55 = vsel %vm1390_vm2, %v1781_v47, -inf }
 0x7d0   : > { %1786 = vmax.xlane.f32.xlu0 %v1785_v55  ;;  %v1897_v56 = vpop.f32.mrb[20].mxu1 }
 0x7d1   : > { %v1904_v57 = vmul.f32 0.125, %v1897_v56  ;;  %v3444_v58 = vpop.f32.mrb[21].mxu1 }
 0x7d2   : > { %v1900_v23 = vpop.f32.mrb[22].mxu1 }
 0x7d3   : > { %v1905_v59 = vmul.f32 0.125, %v1900_v23  ;;  %v3445_v51 = vpop.f32.mrb[23].mxu1  ;;  %v1906_v25 = vadd.f32 %v1904_v57, %v1728_v42 }
 0x7d5   : > { %v1908_v62 = vsel %vm1390_vm2, %v1906_v25, -inf  ;;  %v1907_v63 = vadd.f32 %v1905_v59, %v1728_v42 }
 0x7d6   : > { %1909 = vmax.xlane.f32.xlu1 %v1908_v62 }
 0x7d7   : > { %v1911_v0 = vsel %vm1390_vm2, %v1907_v63, -inf }
 0x7da   : > { %1912 = vmax.xlane.f32.xlu1 %v1911_v0 }
 0x85b   : > { %v1784_v1 = vpop.xlane.xlu1 %1783 }
 0x85c   : > { %v1788_v2 = vsub.f32 %v1780_v53, %v1784_v1 }
 0x85d   : > { %v1787_v3 = vpop.xlane.xlu0 %1786 }
 0x85e   : > { %v1790_v4 = vmul.f32 1.442695, %v1788_v2  ;;  %v1789_v5 = vsub.f32 %v1781_v47, %v1787_v3 }
 0x860   : > { %3729 = vpow2.f32 %v1790_v4  ;;  %v1792_v7 = vmul.f32 1.442695, %v1789_v5 }
 0x862   : > { %3731 = vpow2.f32 %v1792_v7 }
 0x863   : > { %v1910_v11 = vpop.xlane.xlu1 %1909 }
 0x864   : > { %v1914_v12 = vsub.f32 %v1906_v25, %v1910_v11 }
 0x866   : > { %v1916_v13 = vmul.f32 1.442695, %v1914_v12 }
 0x867   : > { %v1913_v16 = vpop.xlane.xlu1 %1912 }
 0x868   : > { %3733 = vpow2.f32 %v1916_v13  ;;  %v1915_v18 = vsub.f32 %v1907_v63, %v1913_v16 }
 0x86a   : > { %v3730_v19 = vpop.eup %3729  ;;  %v1918_v21 = vmul.f32 1.442695, %v1915_v18 }
 0x86b   : > { %v1794_v24 = vsel %vm1390_vm2, %v3730_v19, 0.0 }
 0x86c   : > { %v3732_v26 = vpop.eup %3731  ;;  %3735 = vpow2.f32 %v1918_v21  ;;  %1795 = vadd.xlane.f32.xlu0 %v1794_v24  ;;  %v3675_v24 = vld [vmem:[%s4630_s17 + $0x4] ss:$8 sps:$4 sm:$0xff]  }
 0x86d   : > { %v1797_v27 = vsel %vm1390_vm2, %v3732_v26, 0.0  ;;  %2260 = vmatprep.subr.bf16.mxu1 %v3675_v24 }
 0x86e   : > { %1798 = vadd.xlane.f32.xlu1 %v1797_v27  ;;  %v3678_v27 = vld [vmem:[%s4630_s17 + $0x14] ss:$8 sps:$4 sm:$0xff]  }
 0x872   : > { %v3734_v28 = vpop.eup %3733 }
 0x873   : > { %v1920_v30 = vsel %vm1390_vm2, %v3734_v28, 0.0 }
 0x874   : > { %1921 = vadd.xlane.f32.xlu0 %v1920_v30  ;;  %v3682_v30 = vld [vmem:[%s4630_s17 + $0x30] ss:$8 sps:$4 sm:$0xff]  }
 0x876   : > { %v3736_v31 = vpop.eup %3735 }
 0x877   : > { %v1923_v33 = vsel %vm1390_vm2, %v3736_v31, 0.0 }
 0x878   : > { %1924 = vadd.xlane.f32.xlu1 %v1923_v33  ;;  %v3690_v33 = vld [vmem:[%s4630_s17 + $0x54] ss:$8 sps:$4 sm:$0xff]  }
 0x87c   : > { %2085 = vadd.xlane.f32.xlu1 %v4887_v35 }
 0x880   : > { %2087 = vadd.xlane.f32.xlu1 %v4891_v36 }
 0x88a   : > { %1932 = vrot.lane.b32.xlu0 %v4761_v46, %s4163_s29  ;;  %s5204_s29 = smov (!%p3242_p0), %s5203_s23 }
 0x8f9   : > { %v1796_v38 = vpop.xlane.xlu0 %1795 }
 0x8fa   : > { %3737 = vrcp.f32 %v1796_v38  ;;  %v3696_v38 = vld [vmem:[%s4630_s17 + $0x74] ss:$8 sps:$4 sm:$0xff]  }
 0x8fb   : > { %v1799_v37 = vpop.xlane.xlu1 %1798 }
 0x8fc   : > { %3739 = vrcp.f32 %v1799_v37  ;;  %v3694_v37 = vld [vmem:[%s4630_s17 + $0x70] ss:$8 sps:$4 sm:$0xff]  }
 0x901   : > { %v1922_v39 = vpop.xlane.xlu0 %1921 }
 0x902   : > { %3741 = vrcp.f32 %v1922_v39 }
 0x904   : > { %v3738_v41 = vpop.eup %3737 }
 0x905   : > { %v1925_v40 = vpop.xlane.xlu1 %1924  ;;  %v1802_v42 = vmul.f32 %v3738_v41, %v3730_v19  ;;  %v1933_v61 = vpop.permute.xlu0 %1932 }
 0x906   : > { %v3740_v60 = vpop.eup %3739  ;;  %3743 = vrcp.f32 %v1925_v40 }
 0x907   : > { %v1803_v43 = vmul.f32 %v3740_v60, %v3732_v26  ;;  %v3676_v26 = vld [vmem:[%s4630_s17 + $0x10] ss:$8 sps:$4 sm:$0xff]  }
 0x909   : > { %v1804_v44 = vpack.c.bf16 %v1803_v43, %v1802_v42  ;;  %v2086_v51 = vpop.xlane.xlu1 %2085 }
 0x90a   : > { %v2094_v4 = vmul.f32 0.0078125, %v2086_v51  ;;  %v3699_v51 = vld [vmem:[%s4632_s12 + $0x48] sm:$0xff]  }
 0x90b   : > { %3437 = vmatmul.mubr.msk.bf16.vlgmr.msra.gmra.mrb[20].mxu0 %vm1390_vm2, %v1804_v44 }
 0x90c   : > { %3447 = vmatpush3.bf16.msra.mxu0 %v1933_v61  ;;  %3448 = vmatprep.mubr.msk.bf16.mxu0 %vm4162_vm0, %v4161_v17  ;;  %v3742_v46 = vpop.eup %3741  ;;  %v2098_v12 = vsub.f32 %v4887_v35, %v2094_v4  ;;  %v3693_v35 = vld [vmem:[%s4630_s17 + $0x64] ss:$8 sps:$4 sm:$0xff]  }
 0x90d   : > { %3464 = vmatprep.subr.bf16.mxu0 %v4161_v17  ;;  %v1928_v48 = vmul.f32 %v3742_v46, %v3734_v28  ;;  %v2088_v11 = vpop.xlane.xlu1 %2087  ;;  %v3679_v28 = vld [vmem:[%s4630_s17 + $0x20] ss:$8 sps:$4 sm:$0xff]  }
 0x90e   : > { %v2095_v13 = vmul.f32 0.0078125, %v2088_v11  ;;  %v2102_v19 = vmul.f32 %v2098_v12, %v2098_v12  ;;  %v3708_v4 = vld [vmem:[%s4632_s12 + $0x28] sm:$0xff]  }
 0x910   : > { %v3744_v45 = vpop.eup %3743  ;;  %v2099_v18 = vsub.f32 %v4891_v36, %v2095_v13  ;;  %v3691_v36 = vld [vmem:[%s4630_s17 + $0x60] ss:$8 sps:$4 sm:$0xff]   ;;  %v3711_v13 = vld [vmem:[%s4632_s12 + $0x78] sm:$0xff]  }
 0x911   : > { %v1929_v49 = vmul.f32 %v3744_v45, %v3736_v31  ;;  %v3687_v31 = vld [vmem:[%s4630_s17 + $0x44] ss:$8 sps:$4 sm:$0xff]  }
 0x912   : > { %v2103_v21 = vmul.f32 %v2099_v18, %v2099_v18 }
 0x913   : > { %v1930_v50 = vpack.c.bf16 %v1929_v49, %v1928_v48 }
 0x915   : > { %3449 = vmatmul.mubr.msk.bf16.vlgmr.msra.gmra.mrb[24].mxu0 %vm1390_vm2, %v1930_v50 }
 0x916   : > { %3465 = vmatpush3.bf16.msra.mxu0 %v4820_v6  ;;  %3472 = vmatprep.mubr.msk.bf16.mxu0 %vm4162_vm0, %v4161_v17 }
 0x917   : > { %3466 = vmatprep.subr.bf16.mxu0 %v4161_v17 }
 0x91a   : > { %3467 = vmatpush3.bf16.msra.mxu0 %v4825_v8 }
 0x91b   : > { %3468 = vmatprep.subr.bf16.mxu0 %v4161_v17 }
 0x91e   : > { %3469 = vmatpush3.bf16.msra.mxu0 %v4832_v9 }
 0x91f   : > { %3470 = vmatprep.subr.bf16.mxu0 %v4161_v17 }
 0x922   : > { %3471 = vmatpush3.bf16.msra.mxu0 %v4837_v10 }
 0x9de   : > { %v1843_v53 = vpop.f32.mrb[20].mxu0 }
 0x9df   : > { %v3438_v54 = vpop.f32.mrb[21].mxu0 }
 0x9e0   : > { %v1846_v47 = vpop.f32.mrb[22].mxu0 }
 0x9e1   : > { %v1850_v55 = vpack.c.bf16 %v1846_v47, %v1843_v53  ;;  %v3439_v6 = vpop.f32.mrb[23].mxu0 }
 0x9e3   : > { %3473 = vmatmul.mubr.msk.bf16.vlgmr.msra.gmra.mrb[28].mxu0 %vm1338_vm1, %v1850_v55 }
 0x9e8   : > { %v1972_v56 = vpop.f32.mrb[24].mxu0 }
 0x9e9   : > { %v3450_v57 = vpop.f32.mrb[25].mxu0 }
 0x9ea   : > { %v1975_v58 = vpop.f32.mrb[26].mxu0 }
 0x9eb   : > { %v1979_v23 = vpack.c.bf16 %v1975_v58, %v1972_v56  ;;  %v3451_v8 = vpop.f32.mrb[27].mxu0  ;;  %v3206_v58 = vld [vmem:[%s5198_s26] ss:$0 sm:$0xff] }
 0x9ed   : > { %3461 = vmatmul.mubr.msk.bf16.vlgmr.msra.gmra.mrb[24].mxu1 %vm1338_vm1, %v1979_v23 }
 0x9ee   : > { %2292 = vmatprep.mubr.bf16.mxu1 %v4160_v52 }
 0xab6   : > { %v2061_v9 = vpop.f32.mrb[28].mxu0 }
 0xab7   : > { %v3474_v17 = vpop.f32.mrb[29].mxu0 }
 0xab8   : > { %v2064_v59 = vpop.f32.mrb[30].mxu0 }
 0xab9   : > { %v3475_v10 = vpop.f32.mrb[31].mxu0 }
 0xaba   : > { %v3698_v10 = vld [vmem:[%s4632_s12] sm:$0xff]  }
 0xac0   : > { %v2017_v25 = vpop.f32.mrb[24].mxu1 }
 0xac1   : > { %v2062_v62 = vadd.f32 %v2061_v9, %v2017_v25  ;;  %v3462_v63 = vpop.f32.mrb[25].mxu1  ;;  %v3700_v25 = vld [vmem:[%s4632_s12 + $0x8] sm:$0xff]  }
 0xac2   : > { %v2020_v0 = vpop.f32.mrb[26].mxu1  ;;  %v3702_v63 = vld [vmem:[%s4632_s12 + $0x10] sm:$0xff]  }
 0xac3   : > { %v2077_v1 = vadd.f32 %v4880_v29, %v2062_v62  ;;  %v2065_v2 = vadd.f32 %v2064_v59, %v2020_v0  ;;  %v3463_v3 = vpop.f32.mrb[27].mxu1  ;;  %v3697_v59 = vld [vmem:[%s4632_s12 + $0x40] sm:$0xff]   ;;  %v3701_v62 = vld [vmem:[%s4632_s12 + $0x50] sm:$0xff]   ;;  %v3703_v0 = vld [vmem:[%s4632_s12 + $0x58] sm:$0xff]  }
 0xac4   : > { %3314 = vmatprep.subr.bf16.mxu0 %v3697_v59  ;;  %v3707_v3 = vld [vmem:[%s4632_s12 + $0x68] sm:$0xff]  }
 0xac5   : > { %v2078_v5 = vadd.f32 %v4880_v29, %v2065_v2  ;;  %v2081_v7 = vadd.f32 %v2077_v1, %v4727_v14  ;;  %v3673_v14 = vld [vmem:[%s4630_s17] ss:$8 sps:$4 sm:$0xff]   ;;  %v3684_v29 = vld [vmem:[%s4630_s17 + $0x34] ss:$8 sps:$4 sm:$0xff]   ;;  %3315 = vmatpush3.bf16.msra.mxu0 %v3698_v10 }
 0xac6   : > { %2261 = vmatpush1.bf16.msra.mxu1 %v3673_v14  ;;  %3316 = vmatprep.subr.bf16.mxu0 %v3699_v51  ;;  %v3705_v1 = vld [vmem:[%s4632_s12 + $0x60] sm:$0xff]  }
 0xac7   : > { %2089 = vadd.xlane.f32.xlu1 %v2081_v7  ;;  %v2082_v16 = vadd.f32 %v2078_v5, %v4729_v15  ;;  %2262 = vmatprep.subr.bf16.mxu1 %v3678_v27  ;;  %v3681_v15 = vld [vmem:[%s4630_s17 + $0x24] ss:$8 sps:$4 sm:$0xff]   ;;  %s5197_s17 = scalar_lea.vmem [#allocation8], %s4614_s11  ;;  %v3709_v5 = vld [vmem:[%s4632_s12 + $0x70] sm:$0xff]  }
 0xac8   : > { %v3205_v55 = vld [vmem:[%s5197_s17] ss:$0 sm:$0xff]  ;;  %v3706_v2 = vld [vmem:[%s4632_s12 + $0x20] sm:$0xff]  }
 0xac9   : > { %3317 = vmatpush3.bf16.msra.mxu0 %v3700_v25 }
 0xaca   : > { %2263 = vmatpush1.bf16.msra.mxu1 %v3676_v26  ;;  %3318 = vmatprep.subr.bf16.mxu0 %v3701_v62 }
 0xacb   : > { %2091 = vadd.xlane.f32.xlu1 %v2082_v16  ;;  %2264 = vmatprep.subr.bf16.mxu1 %v3681_v15 }
 0xacd   : > { %3319 = vmatpush3.bf16.msra.mxu0 %v3702_v63 }
 0xace   : > { %2265 = vmatpush1.bf16.msra.mxu1 %v3679_v28  ;;  %3320 = vmatprep.subr.bf16.mxu0 %v3703_v0 }
 0xacf   : > { %2106 = vadd.xlane.f32.xlu1 %v2102_v19  ;;  %2266 = vmatprep.subr.bf16.mxu1 %v3684_v29 }
 0xad2   : > { %2267 = vmatpush1.bf16.msra.mxu1 %v3682_v30 }
 0xad3   : > { %2108 = vadd.xlane.f32.xlu1 %v2103_v21  ;;  %2268 = vmatprep.subr.bf16.mxu1 %v3687_v31 }
 0xad6   : > { %2269 = vmatpush1.bf16.msra.mxu1 %v3685_v32 }
 0xad7   : > { %2270 = vmatprep.subr.bf16.mxu1 %v3690_v33  ;;  %v2168_v33 = vld [vmem:[%s4667_s1] sm:$0x3] }
 0xada   : > { %2271 = vmatpush1.bf16.msra.mxu1 %v3688_v34  ;;  %v2173_v34 = vrot.slane %v2168_v33, %v4739_v20 }
 0xadb   : > { %2272 = vmatprep.subr.bf16.mxu1 %v3693_v35  ;;  %v2177_v35 = vrot.slane %v2168_v33, %v4742_v22 }
 0xade   : > { %2273 = vmatpush1.bf16.msra.mxu1 %v3691_v36 }
 0xadf   : > { %2274 = vmatprep.subr.bf16.mxu1 %v3696_v38 }
 0xae2   : > { %2275 = vmatpush1.bf16.msra.mxu1 %v3694_v37 }
 0xb54   : > { %v2090_v39 = vpop.xlane.xlu1 %2089 }
 0xb55   : > { %v2096_v41 = vmul.f32 0.0078125, %v2090_v39 }
 0xb57   : > { %v4935_v40 = vsub.f32 %v2081_v7, %v2096_v41  ;;  %v3710_v7 = vld [vmem:[%s4632_s12 + $0x30] sm:$0xff]  }
 0xb58   : > { %v2092_v60 = vpop.xlane.xlu1 %2091 }
 0xb59   : > { %v2097_v42 = vmul.f32 0.0078125, %v2092_v60  ;;  %v2104_v43 = vmul.f32 %v4935_v40, %v4935_v40 }
 0xb5b   : > { %v4939_v44 = vsub.f32 %v2082_v16, %v2097_v42  ;;  %2110 = vadd.xlane.f32.xlu0 %v2104_v43  ;;  %v3712_v16 = vld [vmem:[%s4632_s12 + $0x38] sm:$0xff]  }
 0xb5c   : > { %v2107_v61 = vpop.xlane.xlu1 %2106 }
 0xb5d   : > { %v2114_v46 = vmul.f32 0.0078125, %v2107_v61  ;;  %v2105_v45 = vmul.f32 %v4939_v44, %v4939_v44 }
 0xb5f   : > { %v2118_v48 = vadd.f32 1e-12, %v2114_v46  ;;  %2112 = vadd.xlane.f32.xlu1 %v2105_v45 }
 0xb60   : > { %v2109_v49 = vpop.xlane.xlu1 %2108 }
 0xb61   : > { %3745 = vrsqrt.f32 %v2118_v48  ;;  %v2115_v50 = vmul.f32 0.0078125, %v2109_v49 }
 0xb63   : > { %v2119_v53 = vadd.f32 1e-12, %v2115_v50 }
 0xb65   : > { %3747 = vrsqrt.f32 %v2119_v53 }
 0xb6b   : > { %v3746_v54 = vpop.eup %3745 }
 0xb6c   : > { %v2126_v47 = vmul.f32 %v3746_v54, %v2098_v12 }
 0xb6e   : > { %v2136_v57 = vmul.f32 %v3205_v55, %v2126_v47 }
 0xb6f   : > { %v3748_v6 = vpop.eup %3747 }
 0xb70   : > { %v2127_v56 = vmul.f32 %v3748_v6, %v2099_v18  ;;  %v4947_v8 = vadd.f32 %v3206_v58, %v2136_v57 }
 0xb72   : > { %v2137_v23 = vmul.f32 %v3205_v55, %v2127_v56 }
 0xb74   : > { %v4949_v9 = vadd.f32 %v3206_v58, %v2137_v23 }
 0xb76   : > { %v2150_v17 = vpack.c.bf16 %v4949_v9, %v4947_v8 }
 0xb78   : > { %2293 = vmatmul.mubr.bf16.vlgmr.msra.gmra.mrb[28].mxu1 %v2150_v17 }
 0xb79   : > { %2302 = vmatprep.mubr.bf16.mxu1 %v4160_v52  ;;  %v3704_v52 = vld [vmem:[%s4632_s12 + $0x18] sm:$0xff]  }
 0xb7a   : > { %3321 = vmatpush3.bf16.msra.mxu0 %v3704_v52 }
 0xb7b   : > { %3322 = vmatprep.subr.bf16.mxu0 %v3705_v1 }
 0xb7e   : > { %3323 = vmatpush3.bf16.msra.mxu0 %v3706_v2 }
 0xb7f   : > { %3324 = vmatprep.subr.bf16.mxu0 %v3707_v3 }
 0xb82   : > { %3325 = vmatpush3.bf16.msra.mxu0 %v3708_v4 }
 0xb83   : > { %3326 = vmatprep.subr.bf16.mxu0 %v3709_v5 }
 0xb86   : > { %3327 = vmatpush3.bf16.msra.mxu0 %v3710_v7 }
 0xb87   : > { %3328 = vmatprep.subr.bf16.mxu0 %v3711_v13 }
 0xb8a   : > { %3329 = vmatpush3.bf16.msra.mxu0 %v3712_v16 }
 0xbe8   : > { %v2111_v11 = vpop.xlane.xlu0 %2110 }
 0xbe9   : > { %v2116_v12 = vmul.f32 0.0078125, %v2111_v11 }
 0xbeb   : > { %v2120_v18 = vadd.f32 1e-12, %v2116_v12 }
 0xbec   : > { %v2113_v19 = vpop.xlane.xlu1 %2112 }
 0xbed   : > { %3749 = vrsqrt.f32 %v2120_v18  ;;  %v2117_v21 = vmul.f32 0.0078125, %v2113_v19 }
 0xbef   : > { %v2121_v14 = vadd.f32 1e-12, %v2117_v21 }
 0xbf1   : > { %3751 = vrsqrt.f32 %v2121_v14 }
 0xbf7   : > { %v3750_v24 = vpop.eup %3749 }
 0xbf8   : > { %v2128_v26 = vmul.f32 %v3750_v24, %v4935_v40 }
 0xbfa   : > { %v2138_v28 = vmul.f32 %v3205_v55, %v2128_v26 }
 0xbfb   : > { %v3752_v27 = vpop.eup %3751 }
 0xbfc   : > { %v2129_v15 = vmul.f32 %v3752_v27, %v4939_v44  ;;  %v4972_v30 = vadd.f32 %v3206_v58, %v2138_v28 }
 0xbfe   : > { %v2139_v29 = vmul.f32 %v3205_v55, %v2129_v15 }
 0xc00   : > { %v4974_v31 = vadd.f32 %v3206_v58, %v2139_v29 }
 0xc02   : > { %v2151_v32 = vpack.c.bf16 %v4974_v31, %v4972_v30 }
 0xc04   : > { %2303 = vmatmul.mubr.bf16.gmra.mrb[32].mxu1 %v2151_v32 }
 0xc4b   : > { %v2294_v36 = vpop.f32.mrb[28].mxu1 }
 0xc4c   : > { %v2295_v38 = vadd.f32 %v2294_v36, %v2173_v34  ;;  %v2296_v37 = vpop.f32.mrb[29].mxu1 }
 0xc4d   : > { %v2297_v39 = vadd.f32 %v2296_v37, %v2177_v35  ;;  %v2298_v41 = vpop.f32.mrb[30].mxu1 }
 0xc4e   : > { %v2313_v40 = vmul.f32 %v2295_v38, %v2295_v38  ;;  %v2299_v60 = vadd.f32 %v2298_v41, %v2173_v34  ;;  %v2300_v42 = vpop.f32.mrb[31].mxu1 }
 0xc4f   : > { %v2314_v43 = vmul.f32 %v2297_v39, %v2297_v39  ;;  %v2301_v44 = vadd.f32 %v2300_v42, %v2177_v35 }
 0xc50   : > { %v2321_v61 = vmul.f32 %v2313_v40, %v2295_v38  ;;  %v2315_v46 = vmul.f32 %v2299_v60, %v2299_v60 }
 0xc51   : > { %v2322_v45 = vmul.f32 %v2314_v43, %v2297_v39  ;;  %v2316_v48 = vmul.f32 %v2301_v44, %v2301_v44 }
 0xc52   : > { %v2329_v49 = vmul.f32 0.044715, %v2321_v61  ;;  %v2323_v50 = vmul.f32 %v2315_v46, %v2299_v60 }
 0xc53   : > { %v2330_v53 = vmul.f32 0.044715, %v2322_v45  ;;  %v2324_v20 = vmul.f32 %v2316_v48, %v2301_v44 }
 0xc54   : > { %v2337_v54 = vadd.f32 %v2329_v49, %v2295_v38  ;;  %v2331_v22 = vmul.f32 0.044715, %v2323_v50 }
 0xc55   : > { %v2338_v47 = vadd.f32 %v2330_v53, %v2297_v39  ;;  %v2332_v55 = vmul.f32 0.044715, %v2324_v20 }
 0xc56   : > { %v2345_v6 = vmul.f32 0.7978846, %v2337_v54  ;;  %v2339_v56 = vadd.f32 %v2331_v22, %v2299_v60 }
 0xc57   : > { %v2346_v57 = vmul.f32 0.7978846, %v2338_v47  ;;  %v2340_v58 = vadd.f32 %v2332_v55, %v2301_v44 }
 0xc58   : > { %3753 = vtanh.f32 %v2345_v6  ;;  %v2347_v23 = vmul.f32 0.7978846, %v2339_v56 }
 0xc59   : > { %3755 = vtanh.f32 %v2346_v57  ;;  %v2348_v17 = vmul.f32 0.7978846, %v2340_v58 }
 0xc5a   : > { %3757 = vtanh.f32 %v2347_v23 }
 0xc5b   : > { %3759 = vtanh.f32 %v2348_v17 }
 0xc62   : > { %v3754_v59 = vpop.eup %3753 }
 0xc63   : > { %v3756_v10 = vpop.eup %3755  ;;  %v2361_v51 = vadd.f32 1.0, %v3754_v59 }
 0xc64   : > { %v3758_v25 = vpop.eup %3757  ;;  %v2362_v62 = vadd.f32 1.0, %v3756_v10 }
 0xc65   : > { %v3760_v63 = vpop.eup %3759  ;;  %v2369_v0 = vmul.f32 0.5, %v2361_v51  ;;  %v2363_v52 = vadd.f32 1.0, %v3758_v25 }
 0xc66   : > { %v2364_v1 = vadd.f32 1.0, %v3760_v63  ;;  %v2370_v2 = vmul.f32 0.5, %v2362_v62  ;;  %v3223_v63 = vld [vmem:[%s949_s21] ss:$0 sm:$0xff]  ;;  %s5201_s21 = scalar_lea.vmem [#allocation15], %s4614_s11 }
 0xc67   : > { %v2371_v3 = vmul.f32 0.5, %v2363_v52  ;;  %v2377_v5 = vmul.f32 %v2369_v0, %v2295_v38 }
 0xc68   : > { %v2372_v4 = vmul.f32 0.5, %v2364_v1  ;;  %v2378_v11 = vmul.f32 %v2370_v2, %v2297_v39 }
 0xc69   : > { %v2379_v7 = vmul.f32 %v2371_v3, %v2299_v60 }
 0xc6a   : > { %v2380_v12 = vmul.f32 %v2372_v4, %v2301_v44 }
 0xc6b   : > { %v2385_v13 = vpack.c.bf16 %v2379_v7, %v2377_v5 }
 0xc6c   : > { %v2386_v16 = vpack.c.bf16 %v2380_v12, %v2378_v11 }
 0xc6e   : > { %2556 = vmatprep.mubr.bf16.mxu0 %v2386_v16 }
 0xc6f   : > { %2557 = vmatmul.mubr.bf16.vlgmr.msra.gmra.mrb[32].mxu0 %v2385_v13 }
 0xcd7   : > { %v2304_v18 = vpop.f32.mrb[32].mxu1 }
 0xcd8   : > { %v2305_v19 = vadd.f32 %v2304_v18, %v2173_v34  ;;  %v2306_v21 = vpop.f32.mrb[33].mxu1 }
 0xcd9   : > { %v2307_v14 = vadd.f32 %v2306_v21, %v2177_v35  ;;  %v2308_v24 = vpop.f32.mrb[34].mxu1 }
 0xcda   : > { %v2317_v26 = vmul.f32 %v2305_v19, %v2305_v19  ;;  %v2309_v27 = vadd.f32 %v2308_v24, %v2173_v34  ;;  %v2310_v15 = vpop.f32.mrb[35].mxu1 }
 0xcdb   : > { %v2318_v28 = vmul.f32 %v2307_v14, %v2307_v14  ;;  %v2311_v29 = vadd.f32 %v2310_v15, %v2177_v35 }
 0xcdc   : > { %v2325_v32 = vmul.f32 %v2317_v26, %v2305_v19  ;;  %v2319_v33 = vmul.f32 %v2309_v27, %v2309_v27 }
 0xcdd   : > { %v2326_v36 = vmul.f32 %v2318_v28, %v2307_v14  ;;  %v2320_v38 = vmul.f32 %v2311_v29, %v2311_v29 }
 0xcde   : > { %v2333_v37 = vmul.f32 0.044715, %v2325_v32  ;;  %v2327_v39 = vmul.f32 %v2319_v33, %v2309_v27 }
 0xcdf   : > { %v2334_v41 = vmul.f32 0.044715, %v2326_v36  ;;  %v2328_v40 = vmul.f32 %v2320_v38, %v2311_v29 }
 0xce0   : > { %v2341_v60 = vadd.f32 %v2333_v37, %v2305_v19  ;;  %v2335_v42 = vmul.f32 0.044715, %v2327_v39 }
 0xce1   : > { %v2342_v43 = vadd.f32 %v2334_v41, %v2307_v14  ;;  %v2336_v44 = vmul.f32 0.044715, %v2328_v40 }
 0xce2   : > { %v2349_v61 = vmul.f32 0.7978846, %v2341_v60  ;;  %v2343_v46 = vadd.f32 %v2335_v42, %v2309_v27 }
 0xce3   : > { %v2350_v45 = vmul.f32 0.7978846, %v2342_v43  ;;  %v2344_v48 = vadd.f32 %v2336_v44, %v2311_v29 }
 0xce4   : > { %3761 = vtanh.f32 %v2349_v61  ;;  %v2351_v34 = vmul.f32 0.7978846, %v2343_v46 }
 0xce5   : > { %3763 = vtanh.f32 %v2350_v45  ;;  %v2352_v35 = vmul.f32 0.7978846, %v2344_v48 }
 0xce6   : > { %3765 = vtanh.f32 %v2351_v34  ;;  %v3240_v34 = vld [vmem:[%s5200_s30] ss:$0 sm:$0xff] }
 0xce7   : > { %3767 = vtanh.f32 %v2352_v35 }
 0xcee   : > { %v3762_v49 = vpop.eup %3761 }
 0xcef   : > { %v3764_v50 = vpop.eup %3763  ;;  %v2365_v53 = vadd.f32 1.0, %v3762_v49  ;;  %v3241_v49 = vld [vmem:[%s5201_s21] ss:$0 sm:$0xff] }
 0xcf0   : > { %v3766_v20 = vpop.eup %3765  ;;  %v2366_v54 = vadd.f32 1.0, %v3764_v50 }
 0xcf1   : > { %v3768_v22 = vpop.eup %3767  ;;  %v2367_v47 = vadd.f32 1.0, %v3766_v20  ;;  %v2373_v55 = vmul.f32 0.5, %v2365_v53 }
 0xcf2   : > { %v2368_v6 = vadd.f32 1.0, %v3768_v22  ;;  %v2374_v56 = vmul.f32 0.5, %v2366_v54 }
 0xcf3   : > { %v2375_v57 = vmul.f32 0.5, %v2367_v47  ;;  %v2381_v23 = vmul.f32 %v2373_v55, %v2305_v19 }
 0xcf4   : > { %v2376_v58 = vmul.f32 0.5, %v2368_v6  ;;  %v2382_v59 = vmul.f32 %v2374_v56, %v2307_v14 }
 0xcf5   : > { %v2383_v17 = vmul.f32 %v2375_v57, %v2309_v27 }
 0xcf6   : > { %v2384_v10 = vmul.f32 %v2376_v58, %v2311_v29 }
 0xcf7   : > { %v2387_v51 = vpack.c.bf16 %v2383_v17, %v2381_v23 }
 0xcf8   : > { %v2388_v25 = vpack.c.bf16 %v2384_v10, %v2382_v59 }
 0xcfa   : > { %2564 = vmatprep.mubr.bf16.mxu0 %v2388_v25 }
 0xcfb   : > { %2565 = vmatmul.mubr.bf16.gmra.mrb[36].mxu0 %v2387_v51 }
 0xd42   : > { %v3330_v62 = vpop.f32.mrb[32].mxu0 }
 0xd43   : > { %v3331_v0 = vpop.f32.mrb[33].mxu0 }
 0xd44   : > { %v3332_v52 = vadd.f32 %v3331_v0, %v3330_v62  ;;  %v3333_v1 = vpop.f32.mrb[34].mxu0 }
 0xd45   : > { %v3334_v2 = vpop.f32.mrb[35].mxu0 }
 0xd46   : > { %v2559_v3 = vadd.f32 %v3332_v52, %v3223_v63  ;;  %v3335_v4 = vadd.f32 %v3334_v2, %v3333_v1  ;;  %v3777_v52 = vld [vmem:[%s5202_s13] sm:$0xff] (!%p3242_p0)   ;;  %v4164_v1 = vmov (!%p3242_p0), 0.0   ;;  %v3778_v2 = vld [vmem:[%s5202_s13 + $0x8] sm:$0xff] (!%p3242_p0)  }
 0xd47   : > { %3476 = vmatprep.subr.bf16.mxu0 (!%p3242_p0), %v4164_v1  ;;  %3496 = vmatprep.subr.bf16.mxu1 (!%p3242_p0), %v4164_v1 }
 0xd48   : > { %v2562_v5 = vadd.f32 %v3335_v4, %v3223_v63  ;;  %v2573_v7 = vadd.f32 %v2559_v3, %v4947_v8  ;;  %3477 = vmatpush3.bf16.msra.mxu0 (!%p3242_p0), %v3777_v52  ;;  %3492 = vmatprep.mubr.msk.bf16.mxu0 (!%p3242_p0), %vm4165_vm3, %v4164_v1  ;;  %v3779_v3 = vld [vmem:[%s5202_s13 + $0x10] sm:$0xff] (!%p3242_p0)   ;;  %v3785_v4 = vld [vmem:[%s5203_s23] sm:$0xff] (!%p3242_p0)  }
 0xd49   : > { %3478 = vmatprep.subr.bf16.mxu0 (!%p3242_p0), %v4164_v1  ;;  %3512 = vmatprep.mubr.msk.bf16.mxu1 (!%p3242_p0), %vm4165_vm3, %v4164_v1 }
 0xd4a   : > { %2579 = vadd.xlane.f32.xlu1 %v2573_v7  ;;  %v2574_v11 = vadd.f32 %v2562_v5, %v4949_v9  ;;  %v3780_v5 = vld [vmem:[%s5202_s13 + $0x18] sm:$0xff] (!%p3242_p0)   ;;  %3497 = vmatpush3.bf16.msra.mxu1 (!%p3242_p0), %v3785_v4 }
 0xd4b   : > { %3498 = vmatprep.subr.bf16.mxu1 (!%p3242_p0), %v4164_v1 }
 0xd4c   : > { %3479 = vmatpush3.bf16.msra.mxu0 (!%p3242_p0), %v3778_v2 }
 0xd4d   : > { %3480 = vmatprep.subr.bf16.mxu0 (!%p3242_p0), %v4164_v1 }
 0xd4e   : > { %2581 = vadd.xlane.f32.xlu1 %v2574_v11 }
 0xd50   : > { %3481 = vmatpush3.bf16.msra.mxu0 (!%p3242_p0), %v3779_v3 }
 0xd51   : > { %3482 = vmatprep.subr.bf16.mxu0 (!%p3242_p0), %v4164_v1 }
 0xd54   : > { %3483 = vmatpush3.bf16.msra.mxu0 (!%p3242_p0), %v3780_v5 }
 0xd55   : > { %3484 = vmatprep.subr.bf16.mxu0 (!%p3242_p0), %v4164_v1 }
 0xdce   : > { %v3336_v12 = vpop.f32.mrb[36].mxu0 }
 0xdcf   : > { %v3337_v13 = vpop.f32.mrb[37].mxu0 }
 0xdd0   : > { %v3338_v16 = vadd.f32 %v3337_v13, %v3336_v12  ;;  %v3339_v18 = vpop.f32.mrb[38].mxu0  ;;  %v3787_v12 = vld [vmem:[%s5204_s29 + $0x10] sm:$0xff] (!%p3242_p0)   ;;  %v3782_v13 = vld [vmem:[%s5202_s13 + $0x28] sm:$0xff] (!%p3242_p0)  }
 0xdd1   : > { %v3340_v19 = vpop.f32.mrb[39].mxu0 }
 0xdd2   : > { %v2567_v21 = vadd.f32 %v3338_v16, %v3223_v63  ;;  %v3341_v14 = vadd.f32 %v3340_v19, %v3339_v18  ;;  %v3788_v16 = vld [vmem:[%s5204_s29 + $0x18] sm:$0xff] (!%p3242_p0)   ;;  %v3783_v18 = vld [vmem:[%s5202_s13 + $0x30] sm:$0xff] (!%p3242_p0)  }
 0xdd4   : > { %v2570_v24 = vadd.f32 %v3341_v14, %v3223_v63  ;;  %v2575_v26 = vadd.f32 %v2567_v21, %v4972_v30  ;;  %v3784_v21 = vld [vmem:[%s5202_s13 + $0x38] sm:$0xff] (!%p3242_p0)  }
 0xdd6   : > { %2583 = vadd.xlane.f32.xlu1 %v2575_v26  ;;  %v2576_v28 = vadd.f32 %v2570_v24, %v4974_v31 }
 0xdd7   : > { %v2580_v27 = vpop.xlane.xlu1 %2579 }
 0xdd8   : > { %v2587_v15 = vmul.f32 0.0078125, %v2580_v27  ;;  %v3790_v27 = vld [vmem:[%s5204_s29 + $0x28] sm:$0xff] (!%p3242_p0)  }
 0xdda   : > { %v2591_v8 = vsub.f32 %v2573_v7, %v2587_v15  ;;  %2585 = vadd.xlane.f32.xlu1 %v2576_v28  ;;  %v3786_v7 = vld [vmem:[%s5204_s29 + $0x8] sm:$0xff] (!%p3242_p0)   ;;  %v3791_v15 = vld [vmem:[%s5204_s29 + $0x30] sm:$0xff] (!%p3242_p0)  }
 0xddb   : > { %v2582_v29 = vpop.xlane.xlu1 %2581  ;;  %3499 = vmatpush3.bf16.msra.mxu1 (!%p3242_p0), %v3786_v7 }
 0xddc   : > { %v2588_v9 = vmul.f32 0.0078125, %v2582_v29  ;;  %v2595_v32 = vmul.f32 %v2591_v8, %v2591_v8  ;;  %3500 = vmatprep.subr.bf16.mxu1 (!%p3242_p0), %v4164_v1 }
 0xdde   : > { %v2592_v33 = vsub.f32 %v2574_v11, %v2588_v9  ;;  %2599 = vadd.xlane.f32.xlu1 %v2595_v32  ;;  %v3781_v11 = vld [vmem:[%s5202_s13 + $0x20] sm:$0xff] (!%p3242_p0)  }
 0xddf   : > { %3485 = vmatpush3.bf16.msra.mxu0 (!%p3242_p0), %v3781_v11  ;;  %3501 = vmatpush3.bf16.msra.mxu1 (!%p3242_p0), %v3787_v12 }
 0xde0   : > { %v2596_v36 = vmul.f32 %v2592_v33, %v2592_v33  ;;  %3486 = vmatprep.subr.bf16.mxu0 (!%p3242_p0), %v4164_v1  ;;  %3502 = vmatprep.subr.bf16.mxu1 (!%p3242_p0), %v4164_v1 }
 0xde2   : > { %2601 = vadd.xlane.f32.xlu1 %v2596_v36 }
 0xde3   : > { %3487 = vmatpush3.bf16.msra.mxu0 (!%p3242_p0), %v3782_v13  ;;  %3503 = vmatpush3.bf16.msra.mxu1 (!%p3242_p0), %v3788_v16 }
 0xde4   : > { %3488 = vmatprep.subr.bf16.mxu0 (!%p3242_p0), %v4164_v1  ;;  %3504 = vmatprep.subr.bf16.mxu1 (!%p3242_p0), %v4164_v1 }
 0xde7   : > { %3489 = vmatpush3.bf16.msra.mxu0 (!%p3242_p0), %v3783_v18 }
 0xde8   : > { %3490 = vmatprep.subr.bf16.mxu0 (!%p3242_p0), %v4164_v1 }
 0xdeb   : > { %3491 = vmatpush3.bf16.msra.mxu0 (!%p3242_p0), %v3784_v21 }
 0xe63   : > { %v2584_v38 = vpop.xlane.xlu1 %2583 }
 0xe64   : > { %v2589_v37 = vmul.f32 0.0078125, %v2584_v38 }
 0xe66   : > { %v2593_v39 = vsub.f32 %v2575_v26, %v2589_v37  ;;  %v3789_v26 = vld [vmem:[%s5204_s29 + $0x20] sm:$0xff] (!%p3242_p0)  }
 0xe67   : > { %v2586_v41 = vpop.xlane.xlu1 %2585  ;;  %3505 = vmatpush3.bf16.msra.mxu1 (!%p3242_p0), %v3789_v26 }
 0xe68   : > { %v2590_v30 = vmul.f32 0.0078125, %v2586_v41  ;;  %v2597_v40 = vmul.f32 %v2593_v39, %v2593_v39  ;;  %3506 = vmatprep.subr.bf16.mxu1 (!%p3242_p0), %v4164_v1 }
 0xe6a   : > { %v2594_v60 = vsub.f32 %v2576_v28, %v2590_v30  ;;  %2603 = vadd.xlane.f32.xlu0 %v2597_v40  ;;  %v3792_v28 = vld [vmem:[%s5204_s29 + $0x38] sm:$0xff] (!%p3242_p0)  }
 0xe6b   : > { %v2600_v31 = vpop.xlane.xlu1 %2599  ;;  %3507 = vmatpush3.bf16.msra.mxu1 (!%p3242_p0), %v3790_v27 }
 0xe6c   : > { %v2607_v42 = vmul.f32 0.0078125, %v2600_v31  ;;  %v2598_v43 = vmul.f32 %v2594_v60, %v2594_v60  ;;  %3508 = vmatprep.subr.bf16.mxu1 (!%p3242_p0), %v4164_v1 }
 0xe6e   : > { %v2611_v44 = vadd.f32 1e-12, %v2607_v42  ;;  %2605 = vadd.xlane.f32.xlu1 %v2598_v43 }
 0xe6f   : > { %v2602_v61 = vpop.xlane.xlu1 %2601  ;;  %3509 = vmatpush3.bf16.msra.mxu1 (!%p3242_p0), %v3791_v15 }
 0xe70   : > { %3769 = vrsqrt.f32 %v2611_v44  ;;  %v2608_v46 = vmul.f32 0.0078125, %v2602_v61  ;;  %3510 = vmatprep.subr.bf16.mxu1 (!%p3242_p0), %v4164_v1 }
 0xe72   : > { %v2612_v45 = vadd.f32 1e-12, %v2608_v46 }
 0xe73   : > { %3511 = vmatpush3.bf16.msra.mxu1 (!%p3242_p0), %v3792_v28 }
 0xe74   : > { %3771 = vrsqrt.f32 %v2612_v45 }
 0xe7a   : > { %v3770_v48 = vpop.eup %3769 }
 0xe7b   : > { %v2619_v35 = vmul.f32 %v3770_v48, %v2591_v8  ;;  %v3243_v8 = vld [vmem:[#allocation17] ss:$0 sm:$0xff] (!%p3242_p0) }
 0xe7d   : > { %v2629_v50 = vmul.f32 %v3240_v34, %v2619_v35 }
 0xe7e   : > { %v3772_v53 = vpop.eup %3771 }
 0xe7f   : > { %v4994_v20 = vadd.f32 %v3241_v49, %v2629_v50  ;;  %v2620_v54 = vmul.f32 %v3772_v53, %v2592_v33 }
 0xe81   : > { %2643 = vst [vmem:[#allocation2] sm:$0xff] %v4994_v20  ;;  %v2630_v22 = vmul.f32 %v3240_v34, %v2620_v54 }
 0xe83   : > { %v2640_v47 = vadd.f32 %v3241_v49, %v2630_v22 }
 0xe85   : > { %2644 = vst [vmem:[#allocation2 + $0x8] sm:$0xff] %v2640_v47 }
 0xef7   : > { %v2604_v55 = vpop.xlane.xlu0 %2603 }
 0xef8   : > { %v2609_v6 = vmul.f32 0.0078125, %v2604_v55 }
 0xefa   : > { %v2613_v56 = vadd.f32 1e-12, %v2609_v6 }
 0xefb   : > { %v2606_v57 = vpop.xlane.xlu1 %2605 }
 0xefc   : > { %3773 = vrsqrt.f32 %v2613_v56  ;;  %v2610_v58 = vmul.f32 0.0078125, %v2606_v57 }
 0xefe   : > { %v2614_v23 = vadd.f32 1e-12, %v2610_v58 }
 0xf00   : > { %3775 = vrsqrt.f32 %v2614_v23 }
 0xf06   : > { %v3774_v17 = vpop.eup %3773 }
 0xf07   : > { %v2621_v59 = vmul.f32 %v3774_v17, %v2593_v39  ;;  %v3252_v39 = vld [vmem:[%s5205_s16] ss:$0 sm:$0xff] (!%p3242_p0) }
 0xf09   : > { %v2631_v10 = vmul.f32 %v3240_v34, %v2621_v59 }
 0xf0a   : > { %v3776_v51 = vpop.eup %3775 }
 0xf0b   : > { %v2641_v25 = vadd.f32 %v3241_v49, %v2631_v10  ;;  %v2622_v62 = vmul.f32 %v3776_v51, %v2594_v60  ;;  %2650 = sbr.rel (%p3242_p0) target bundleno = 4300 (0x10cc), region = 144 }
 0xf0d   : > { %2645 = vst [vmem:[#allocation2 + $0x10] sm:$0xff] %v2641_v25  ;;  %v2632_v63 = vmul.f32 %v3240_v34, %v2622_v62  ;;  %v2652_v19 = vrot.slane (!%p3242_p0), %v2641_v25, 7 }
 0xf0f   : > { %v2642_v0 = vadd.f32 %v3241_v49, %v2632_v63  ;;  %v2655_v14 = vsel (!%p3242_p0), %vm2654_vm4, %v4994_v20, %v2652_v19 }
 0xf10   : > { %v2656_v24 = vpack.c.bf16 (!%p3242_p0), %v2655_v14, %v2655_v14 }
 0xf11   : > { %2646 = vst [vmem:[#allocation2 + $0x18] sm:$0xff] %v2642_v0 }
 0xf12   : > { %3493 = vmatmul.mubr.bf16.vlgmr.msra.gmra.mrb[0].mxu0 %v2656_v24 }
 0xfe5   : > { %v2762_v29 = vpop.f32.mrb[0].mxu0 }
 0xfe6   : > { %v2763_v9 = vadd.f32 %v3243_v8, %v2762_v29  ;;  %v3494_v32 = vpop.f32.mrb[1].mxu0 }
 0xfe7   : > { %v2765_v33 = vpop.f32.mrb[2].mxu0 }
 0xfe8   : > { %3793 = vtanh.f32 %v2763_v9  ;;  %v3495_v36 = vpop.f32.mrb[3].mxu0 }
 0xff2   : > { %v3794_v38 = vpop.eup %3793 }
 0xff3   : > { %v2769_v37 = vpack.c.bf16 %v3794_v38, %v3794_v38 }
 0xff5   : > { %3513 = vmatmul.mubr.bf16.vlgmr.msra.gmra.mrb[0].mxu1 %v2769_v37 }
0x10c8   : > { %v2875_v41 = vpop.f32.mrb[0].mxu1 }
0x10c9   : > { %v2876_v30 = vadd.f32 %v3252_v39, %v2875_v41  ;;  %v3514_v40 = vpop.f32.mrb[1].mxu1 }
0x10ca   : > { %v2878_v60 = vpop.f32.mrb[2].mxu1 }
0x10cb   : > { %2881 = vst [vmem:[#allocation18] sm:$0x3] %v2876_v30  ;;  %v3515_v31 = vpop.f32.mrb[3].mxu1 }
0x10cc PF: > { %p3578_p7 = scmp.eq.s32.totalorder %s4291_s2, 1  ;;  %s4166_s0 = smov [#allocation18]  }
0x10cd   : > { %s2889_s17 = sshll.u32 %s4166_s0, 4  ;;  %s2890_s17 = int_to_ptr.vmem [resolvable:$true] %s2889_s17 }
0x10ce   : > { %s4061_s26 = scalar_lea.vmem %s2890_s17, 32  ;;  %p4068_p9 = scmp.lt.s32.totalorder %s2890_s17, %s2890_s17 }
0x10cf   : > { %p4062_p13 = scmp.ne.s32.totalorder %s2890_s17, %s4061_s26  ;;  %p4069_p10 = scmp.lt.s32.totalorder %s4061_s26, %s4061_s26 }
0x10d1   : > { %p4063_p11 = pnand %p4062_p13, %p3578_p7  ;;  %p4070_p1 = por %p4069_p10, %p4068_p9 }
0x10d3   : > { %p4064_p3 = pneg %p4063_p11 }
0x10d5   : > { %p4071_p6 = pnand %p4070_p1, %p4064_p3 }
0x10d7   : > { %4074 = shalt.err (!%p4071_p6)
}
0x10d8   : > { %s5206_s4 = sld [smem:[#allocation47_spill]] }
0x10de   : > { %s4075_s30 = scalar_lea.hbm %s5206_s4, 32 }
0x10df   : > { %p4076_p12 = scmp.ne.s32.totalorder %s5206_s4, %s4075_s30  ;;  %p4081_p8 = scmp.lt.u32.totalorder %s4075_s30, %s5206_s4 }
0x10e1   : > { %p4077_p2 = pnand %p4076_p12, %p3578_p7 }
0x10e3   : > { %p4078_p5 = pneg %p4077_p2 }
0x10e5   : > { %p4083_p4 = pnand %p4081_p8, %p4078_p5 }
0x10e7   : > { %4086 = shalt.err (!%p4083_p4)
}
0x10e8   : > { %3541 = dma.vmem_to_hbm [thread:$0]  (%p3578_p7), %s2890_s17, 32, %s5206_s4, [#allocation5]  }
0x10e9   : > { %4128 = dma.done.wait (%p3578_p7), [#allocation5], 32  }
0x10ea   : > { %4130 = vsyncadd (%p3578_p7), [#allocation5], 4294967264 }
0x10eb PF: > { %s5207_s24 = sld [smem:[#allocation27_spill]]  ;;  %s5208_s8 = sld [smem:[#allocation26_spill]] }
0x10ec   : > { %s5209_s23 = sld [smem:[#allocation28_spill]]  ;;  %s5210_s1 = smov %s4137_s22 }
0x10f1   : > { %p41_p0 = scmp.ge.s32.totalorder %s5207_s24, 4   ;;  %s5211_s22 = smov %s5208_s8 }
0x10f3   :  { %43 = sbr.rel (!%p41_p0) target bundleno = 30 (0x1e), region = 241 }
0x10fa   :  { %2902 = vsyncpa [#allocation4], 1 }
0x10fb   :  { %2904 = vsyncpa [#allocation4 + $0x1], 1 }
0x10fc   :  { %2905 = vsyncpa [#allocation7], 1 }
0x10fd   :  { %2907 = vsyncpa [#allocation7 + $0x1], 1 }
0x10fe   :  { %2908 = vsyncpa [#allocation10], 1 }
0x10ff   :  { %2910 = vsyncpa [#allocation10 + $0x1], 1 }
0x1100   :  { %2911 = vsyncpa [#allocation13], 1 }
0x1101   :  { %2913 = vsyncpa [#allocation13 + $0x1], 1 }
0x1102   :  { %2914 = vsyncpa [#allocation16], 1 }
0x1103   :  { %2916 = vsyncpa [#allocation16 + $0x1], 1 }
0x1104   :  { %2917 = vsyncpa [#allocation5], 1 }
0x1105   :  { %2919 = vsyncpa [#allocation5 + $0x1], 1 }

</bundles_post_ra>
